<compile_context>
chip_gen: v6e
topology: v6e:2x2x1
jax: 0.10.0
libtpu: 0.0.40
codegen_flags: <defaults>
</compile_context>

<pallas_src>
import jax
import jax.numpy as jnp
from jax.experimental import pallas as pl
from jax.experimental.pallas import tpu as pltpu


def _round_up(n, m):
    return ((n + m - 1) // m) * m


# ----------------------------------------------------------------------------
# Pallas kernel 1: fused  out = relu(x @ w + b)   (conv1 / conv2 matmuls)
#   x: bf16 (tm, K) tile, w: bf16 (K, N), b: f32 (1, N)  -> f32 (tm, N)
# ----------------------------------------------------------------------------
def _mm_bias_relu_kernel(x_ref, w_ref, b_ref, o_ref):
    acc = jnp.dot(x_ref[...], w_ref[...], preferred_element_type=jnp.float32)
    o_ref[...] = jnp.maximum(acc + b_ref[...], 0.0)


def fused_matmul_bias_relu(x, w, b, *, tm_max=256):
    """x: (M, K) bf16, w: (K, N) bf16, b: (N,) f32 -> (M, N) f32."""
    M, K = x.shape
    Kw, N = w.shape
    assert K == Kw, (K, Kw)
    tm = min(tm_max, _round_up(M, 8))
    Mp = _round_up(M, tm)
    if Mp != M:
        x = jnp.pad(x, ((0, Mp - M), (0, 0)))
    flops = 2 * Mp * K * N
    bytes_accessed = Mp * K * 2 + K * N * 2 + N * 4 + Mp * N * 4
    out = pl.pallas_call(
        _mm_bias_relu_kernel,
        out_shape=jax.ShapeDtypeStruct((Mp, N), jnp.float32),
        grid=(Mp // tm,),
        in_specs=[
            pl.BlockSpec((tm, K), lambda i: (i, 0)),
            pl.BlockSpec((K, N), lambda i: (0, 0)),
            pl.BlockSpec((1, N), lambda i: (0, 0)),
        ],
        out_specs=pl.BlockSpec((tm, N), lambda i: (i, 0)),
        compiler_params=pltpu.CompilerParams(dimension_semantics=("parallel",)),
        cost_estimate=pl.CostEstimate(flops=int(flops), transcendentals=0,
                                      bytes_accessed=int(bytes_accessed)),
    )(x, w, b.reshape(1, N))
    return out[:M]


# ----------------------------------------------------------------------------
# Pallas kernel 2: fused conv3 + fc1 + fc2 head.
#   p3: bf16 (P, tb, K3) conv3 patches, position-major (P = h3*w3)
#   w3: bf16 (K3, 64), w1: bf16 (P, 64, 512) (fc1 weights grouped per spatial
#   position), w2: bf16 (512, A).  Intermediates stay in VMEM / vregs.
# ----------------------------------------------------------------------------
def _head_kernel(p3_ref, w3_ref, b3_ref, w1_ref, b1_ref, w2_ref, b2_ref, o_ref):
    num_pos, tb, _ = p3_ref.shape
    hidden = w1_ref.shape[2]
    w3 = w3_ref[...]
    b3 = b3_ref[...]
    acc = jnp.zeros((tb, hidden), jnp.float32)
    # Static unrolled loop over the h3*w3 conv3 output positions: conv3 matmul
    # + bias + ReLU for that position, then immediately accumulate its fc1
    # contribution.  conv3 activations / fc1 hidden never leave the chip.
    for p in range(num_pos):
        y = jnp.dot(p3_ref[p], w3, preferred_element_type=jnp.float32)
        y = jnp.maximum(y + b3, 0.0)                       # (tb, 64) f32
        acc = acc + jnp.dot(y.astype(jnp.bfloat16), w1_ref[p],
                            preferred_element_type=jnp.float32)
    h = jnp.maximum(acc + b1_ref[...], 0.0)                # fc1 + ReLU
    out = jnp.dot(h.astype(jnp.bfloat16), w2_ref[...],
                  preferred_element_type=jnp.float32) + b2_ref[...]
    o_ref[...] = out


def fused_conv3_fc_head(p3, w3, b3, w1, b1, w2, b2):
    """p3: (P, B, K3) bf16 -> (B, num_actions) f32."""
    P, B, K3 = p3.shape
    C3 = w3.shape[1]
    H1 = w1.shape[2]
    A = w2.shape[1]
    if B <= 64:
        tb, Bp = B, B
    else:
        tb = 64
        Bp = _round_up(B, tb)
        p3 = jnp.pad(p3, ((0, 0), (0, Bp - B), (0, 0)))
    flops = 2 * Bp * (P * K3 * C3 + P * C3 * H1 + H1 * A)
    bytes_accessed = (P * Bp * K3 + K3 * C3 + P * C3 * H1 + H1 * A) * 2 \
        + (C3 + H1 + A + Bp * A) * 4
    out = pl.pallas_call(
        _head_kernel,
        out_shape=jax.ShapeDtypeStruct((Bp, A), jnp.float32),
        grid=(Bp // tb,),
        in_specs=[
            pl.BlockSpec((P, tb, K3), lambda i: (0, i, 0)),
            pl.BlockSpec((K3, C3), lambda i: (0, 0)),
            pl.BlockSpec((1, C3), lambda i: (0, 0)),
            pl.BlockSpec((P, C3, H1), lambda i: (0, 0, 0)),
            pl.BlockSpec((1, H1), lambda i: (0, 0)),
            pl.BlockSpec((H1, A), lambda i: (0, 0)),
            pl.BlockSpec((1, A), lambda i: (0, 0)),
        ],
        out_specs=pl.BlockSpec((tb, A), lambda i: (i, 0)),
        compiler_params=pltpu.CompilerParams(dimension_semantics=("parallel",)),
        cost_estimate=pl.CostEstimate(flops=int(flops), transcendentals=0,
                                      bytes_accessed=int(bytes_accessed)),
    )(p3, w3, b3.reshape(1, C3), w1, b1.reshape(1, H1), w2, b2.reshape(1, A))
    return out[:B]


# ----------------------------------------------------------------------------
# JAX glue: NHWC im2col (no big transpose — patches stacked on a middle axis)
# K order is (kh, kw, Cin), matching the weight prep at init.
# ----------------------------------------------------------------------------
def _im2col_nhwc(x, kh, kw, stride):
    """x: (B, H, W, C) -> (B, OH, OW, kh*kw*C)."""
    B, H, W, C = x.shape
    OH = (H - kh) // stride + 1
    OW = (W - kw) // stride + 1
    cols = []
    for i in range(kh):
        for j in range(kw):
            cols.append(x[:, i:i + stride * OH:stride, j:j + stride * OW:stride, :])
    p = jnp.stack(cols, axis=3)                      # (B, OH, OW, kh*kw, C)
    return p.reshape(B, OH, OW, kh * kw * C), OH, OW


# ----------------------------------------------------------------------------
# Parameter init (PyTorch default U(-1/sqrt(fan_in), ..), then re-laid-out
# once for the Pallas kernels; mapping is exactly torch-equivalent).
# ----------------------------------------------------------------------------
def _init_conv(key, cout, cin, k):
    fan_in = cin * k * k
    bound = 1.0 / (fan_in ** 0.5)
    kw_, kb_ = jax.random.split(key)
    w = jax.random.uniform(kw_, (cout, cin, k, k), jnp.float32, -bound, bound)
    b = jax.random.uniform(kb_, (cout,), jnp.float32, -bound, bound)
    return w, b


def _init_linear(key, in_f, out_f):
    bound = 1.0 / (in_f ** 0.5)
    kw_, kb_ = jax.random.split(key)
    w = jax.random.uniform(kw_, (out_f, in_f), jnp.float32, -bound, bound)
    b = jax.random.uniform(kb_, (out_f,), jnp.float32, -bound, bound)
    return w, b


def init_mnih2015(key, image_shape, num_channels, num_actions):
    H, W = image_shape
    h1, w1 = (H - 8) // 4 + 1, (W - 8) // 4 + 1
    h2, w2 = (h1 - 4) // 2 + 1, (w1 - 4) // 2 + 1
    h3, w3 = (h2 - 3) // 1 + 1, (w2 - 3) // 1 + 1
    conv3_size = 64 * h3 * w3

    k1, k2, k3, k4, k5 = jax.random.split(key, 5)
    c1w, c1b = _init_conv(k1, 32, num_channels, 8)
    c2w, c2b = _init_conv(k2, 64, 32, 4)
    c3w, c3b = _init_conv(k3, 64, 64, 3)
    f1w, f1b = _init_linear(k4, conv3_size, 512)
    f2w, f2b = _init_linear(k5, 512, num_actions)

    def prep_conv(w):  # (Cout, Cin, kh, kw) -> (kh*kw*Cin, Cout), bf16
        cout, cin, kh, kw = w.shape
        return w.transpose(2, 3, 1, 0).reshape(kh * kw * cin, cout).astype(jnp.bfloat16)

    # fc1 columns are in torch's NCHW flatten order (C, H, W); regroup them
    # position-major (P, C, out) so the fused head kernel can consume NHWC
    # conv3 output with plain contiguous slices.
    f1w_r = f1w.reshape(512, 64, h3 * w3).transpose(2, 1, 0).astype(jnp.bfloat16)
    f2w_r = f2w.T.astype(jnp.bfloat16)               # (512, A)

    return {
        'conv1_w': prep_conv(c1w), 'conv1_b': c1b,
        'conv2_w': prep_conv(c2w), 'conv2_b': c2b,
        'conv3_w': prep_conv(c3w), 'conv3_b': c3b,
        'fc1_w': f1w_r, 'fc1_b': f1b,
        'fc2_w': f2w_r, 'fc2_b': f2b,
    }


# ----------------------------------------------------------------------------
# Forward pass (semantics match Mnih2015.forward; NCHW input like PyTorch)
# ----------------------------------------------------------------------------
def mnih2015_forward(params, x):
    """x: (B, C, H, W) f32 -> (B, num_actions) f32."""
    B = x.shape[0]
    x = jnp.transpose(x, (0, 2, 3, 1))               # NCHW -> NHWC, once

    # conv1 + ReLU
    p1, oh1, ow1 = _im2col_nhwc(x, 8, 8, 4)
    y1 = fused_matmul_bias_relu(
        p1.reshape(B * oh1 * ow1, -1).astype(jnp.bfloat16),
        params['conv1_w'], params['conv1_b'])
    y1 = y1.reshape(B, oh1, ow1, 32)

    # conv2 + ReLU
    p2, oh2, ow2 = _im2col_nhwc(y1, 4, 4, 2)
    y2 = fused_matmul_bias_relu(
        p2.reshape(B * oh2 * ow2, -1).astype(jnp.bfloat16),
        params['conv2_w'], params['conv2_b'])
    y2 = y2.reshape(B, oh2, ow2, 64)

    # conv3 + ReLU + fc1 + ReLU + fc2 fused in one kernel
    p3, oh3, ow3 = _im2col_nhwc(y2, 3, 3, 1)         # (B, OH3, OW3, K3)
    p3 = p3.transpose(1, 2, 0, 3).reshape(oh3 * ow3, B, -1).astype(jnp.bfloat16)
    out = fused_conv3_fc_head(
        p3, params['conv3_w'], params['conv3_b'],
        params['fc1_w'], params['fc1_b'],
        params['fc2_w'], params['fc2_b'])
    return out


if __name__ == "__main__":
    key = jax.random.PRNGKey(0)
    # Small shapes consistent with the stride-8/4/3 conv stack:
    # 44x44 -> 10x10 -> 4x4 -> 2x2  => conv3_size = 64*2*2 = 256
    image_shape = (44, 44)
    num_channels = 4
    num_actions = 6
    batch = 2

    kp, kx = jax.random.split(key)
    params = init_mnih2015(kp, image_shape, num_channels, num_actions)
    x = jax.random.normal(kx, (batch, num_channels, *image_shape), jnp.float32)

    fwd = jax.jit(mnih2015_forward)
    out = jax.block_until_ready(fwd(params, x))
    assert out.shape == (batch, num_actions), out.shape
    assert out.dtype == jnp.float32
    print("KERNEL_OK")
</pallas_src>

<mosaic_0001>
module attributes {stable_mosaic.version = 11 : i64} {
  func.func @_mm_bias_relu_kernel(%arg0: i32, %arg1: memref<200x256xbf16, #tpu.memory_space<vmem>>, %arg2: memref<256x32xbf16, #tpu.memory_space<vmem>>, %arg3: memref<1x32xf32, #tpu.memory_space<vmem>>, %arg4: memref<200x32xf32, #tpu.memory_space<vmem>>) attributes {dimension_semantics = [#tpu.dimension_semantics<parallel>], iteration_bounds = array<i64: 1>, scalar_prefetch = 0 : i64, scratch_operands = 0 : i64, tpu.core_type = #tpu.core_type<tc>, window_params = [{transform_indices = @transform_0, window_bounds = array<i64: 200, 256>}, {pipeline_mode = #tpu.pipeline_mode<synchronous>, transform_indices = @transform_1, window_bounds = array<i64: 256, 32>}, {pipeline_mode = #tpu.pipeline_mode<synchronous>, transform_indices = @transform_2, window_bounds = array<i64: 1, 32>}, {transform_indices = @transform_3, window_bounds = array<i64: 200, 32>}]} {
    %c0 = arith.constant 0 : index
    %c0_0 = arith.constant 0 : index
    %0 = vector.load %arg1[%c0, %c0_0] : memref<200x256xbf16, #tpu.memory_space<vmem>>, vector<200x256xbf16>
    %c0_1 = arith.constant 0 : index
    %c0_2 = arith.constant 0 : index
    %1 = vector.load %arg2[%c0_1, %c0_2] : memref<256x32xbf16, #tpu.memory_space<vmem>>, vector<256x32xbf16>
    %cst = arith.constant dense<0.000000e+00> : vector<200x32xf32>
    %2 = tpu.matmul %0, %1, %cst {dimension_numbers = #tpu.dot_dimension_numbers<[1], [0], [0], [1], [0, 0, 1, 1], [], []>} : vector<200x256xbf16>, vector<256x32xbf16>, vector<200x32xf32> -> vector<200x32xf32>
    %c0_3 = arith.constant 0 : index
    %c0_4 = arith.constant 0 : index
    %3 = vector.load %arg3[%c0_3, %c0_4] : memref<1x32xf32, #tpu.memory_space<vmem>>, vector<1x32xf32>
    %4 = vector.broadcast %3 : vector<1x32xf32> to vector<200x32xf32>
    %5 = arith.addf %2, %4 : vector<200x32xf32>
    %cst_5 = arith.constant 0.000000e+00 : f32
    %6 = vector.broadcast %cst_5 : f32 to vector<200x32xf32>
    %7 = arith.maximumf %5, %6 : vector<200x32xf32>
    %c0_6 = arith.constant 0 : index
    %c0_7 = arith.constant 0 : index
    %8 = vector.load %arg4[%c0_6, %c0_7] : memref<200x32xf32, #tpu.memory_space<vmem>>, vector<200x32xf32>
    tpu.vector_store %arg4[%c0_6, %c0_7], %7 {strides = array<i32>} : memref<200x32xf32, #tpu.memory_space<vmem>>, vector<200x32xf32>,
    return
  }
  func.func @transform_0(%arg0: i32) -> (i32, i32) {
    %c0_i32 = arith.constant 0 : i32
    %c0_i32_0 = arith.constant 0 : i32
    return %arg0, %c0_i32 : i32, i32
  }
  func.func @transform_1(%arg0: i32) -> (i32, i32) {
    %c0_i32 = arith.constant 0 : i32
    %c0_i32_0 = arith.constant 0 : i32
    %c0_i32_1 = arith.constant 0 : i32
    return %c0_i32, %c0_i32_0 : i32, i32
  }
  func.func @transform_2(%arg0: i32) -> (i32, i32) {
    %c0_i32 = arith.constant 0 : i32
    %c0_i32_0 = arith.constant 0 : i32
    %c0_i32_1 = arith.constant 0 : i32
    return %c0_i32, %c0_i32_0 : i32, i32
  }
  func.func @transform_3(%arg0: i32) -> (i32, i32) {
    %c0_i32 = arith.constant 0 : i32
    %c0_i32_0 = arith.constant 0 : i32
    return %arg0, %c0_i32 : i32, i32
  }
}

module attributes {stable_mosaic.version = 11 : i64} {
  func.func @_mm_bias_relu_kernel(%arg0: i32, %arg1: memref<32x512xbf16, #tpu.memory_space<vmem>>, %arg2: memref<512x64xbf16, #tpu.memory_space<vmem>>, %arg3: memref<1x64xf32, #tpu.memory_space<vmem>>, %arg4: memref<32x64xf32, #tpu.memory_space<vmem>>) attributes {dimension_semantics = [#tpu.dimension_semantics<parallel>], iteration_bounds = array<i64: 1>, scalar_prefetch = 0 : i64, scratch_operands = 0 : i64, tpu.core_type = #tpu.core_type<tc>, window_params = [{transform_indices = @transform_0, window_bounds = array<i64: 32, 512>}, {pipeline_mode = #tpu.pipeline_mode<synchronous>, transform_indices = @transform_1, window_bounds = array<i64: 512, 64>}, {pipeline_mode = #tpu.pipeline_mode<synchronous>, transform_indices = @transform_2, window_bounds = array<i64: 1, 64>}, {transform_indices = @transform_3, window_bounds = array<i64: 32, 64>}]} {
    %c0 = arith.constant 0 : index
    %c0_0 = arith.constant 0 : index
    %0 = vector.load %arg1[%c0, %c0_0] : memref<32x512xbf16, #tpu.memory_space<vmem>>, vector<32x512xbf16>
    %c0_1 = arith.constant 0 : index
    %c0_2 = arith.constant 0 : index
    %1 = vector.load %arg2[%c0_1, %c0_2] : memref<512x64xbf16, #tpu.memory_space<vmem>>, vector<512x64xbf16>
    %cst = arith.constant dense<0.000000e+00> : vector<32x64xf32>
    %2 = tpu.matmul %0, %1, %cst {dimension_numbers = #tpu.dot_dimension_numbers<[1], [0], [0], [1], [0, 0, 1, 1], [], []>} : vector<32x512xbf16>, vector<512x64xbf16>, vector<32x64xf32> -> vector<32x64xf32>
    %c0_3 = arith.constant 0 : index
    %c0_4 = arith.constant 0 : index
    %3 = vector.load %arg3[%c0_3, %c0_4] : memref<1x64xf32, #tpu.memory_space<vmem>>, vector<1x64xf32>
    %4 = vector.broadcast %3 : vector<1x64xf32> to vector<32x64xf32>
    %5 = arith.addf %2, %4 : vector<32x64xf32>
    %cst_5 = arith.constant 0.000000e+00 : f32
    %6 = vector.broadcast %cst_5 : f32 to vector<32x64xf32>
    %7 = arith.maximumf %5, %6 : vector<32x64xf32>
    %c0_6 = arith.constant 0 : index
    %c0_7 = arith.constant 0 : index
    %8 = vector.load %arg4[%c0_6, %c0_7] : memref<32x64xf32, #tpu.memory_space<vmem>>, vector<32x64xf32>
    tpu.vector_store %arg4[%c0_6, %c0_7], %7 {strides = array<i32>} : memref<32x64xf32, #tpu.memory_space<vmem>>, vector<32x64xf32>,
    return
  }
  func.func @transform_0(%arg0: i32) -> (i32, i32) {
    %c0_i32 = arith.constant 0 : i32
    %c0_i32_0 = arith.constant 0 : i32
    return %arg0, %c0_i32 : i32, i32
  }
  func.func @transform_1(%arg0: i32) -> (i32, i32) {
    %c0_i32 = arith.constant 0 : i32
    %c0_i32_0 = arith.constant 0 : i32
    %c0_i32_1 = arith.constant 0 : i32
    return %c0_i32, %c0_i32_0 : i32, i32
  }
  func.func @transform_2(%arg0: i32) -> (i32, i32) {
    %c0_i32 = arith.constant 0 : i32
    %c0_i32_0 = arith.constant 0 : i32
    %c0_i32_1 = arith.constant 0 : i32
    return %c0_i32, %c0_i32_0 : i32, i32
  }
  func.func @transform_3(%arg0: i32) -> (i32, i32) {
    %c0_i32 = arith.constant 0 : i32
    %c0_i32_0 = arith.constant 0 : i32
    return %arg0, %c0_i32 : i32, i32
  }
}

module attributes {stable_mosaic.version = 11 : i64} {
  func.func @_head_kernel(%arg0: i32, %arg1: memref<4x2x576xbf16, #tpu.memory_space<vmem>>, %arg2: memref<576x64xbf16, #tpu.memory_space<vmem>>, %arg3: memref<1x64xf32, #tpu.memory_space<vmem>>, %arg4: memref<4x64x512xbf16, #tpu.memory_space<vmem>>, %arg5: memref<1x512xf32, #tpu.memory_space<vmem>>, %arg6: memref<512x6xbf16, #tpu.memory_space<vmem>>, %arg7: memref<1x6xf32, #tpu.memory_space<vmem>>, %arg8: memref<2x6xf32, #tpu.memory_space<vmem>>) attributes {dimension_semantics = [#tpu.dimension_semantics<parallel>], iteration_bounds = array<i64: 1>, scalar_prefetch = 0 : i64, scratch_operands = 0 : i64, tpu.core_type = #tpu.core_type<tc>, window_params = [{transform_indices = @transform_0, window_bounds = array<i64: 4, 2, 576>}, {pipeline_mode = #tpu.pipeline_mode<synchronous>, transform_indices = @transform_1, window_bounds = array<i64: 576, 64>}, {pipeline_mode = #tpu.pipeline_mode<synchronous>, transform_indices = @transform_2, window_bounds = array<i64: 1, 64>}, {pipeline_mode = #tpu.pipeline_mode<synchronous>, transform_indices = @transform_3, window_bounds = array<i64: 4, 64, 512>}, {pipeline_mode = #tpu.pipeline_mode<synchronous>, transform_indices = @transform_4, window_bounds = array<i64: 1, 512>}, {pipeline_mode = #tpu.pipeline_mode<synchronous>, transform_indices = @transform_5, window_bounds = array<i64: 512, 6>}, {pipeline_mode = #tpu.pipeline_mode<synchronous>, transform_indices = @transform_6, window_bounds = array<i64: 1, 6>}, {transform_indices = @transform_7, window_bounds = array<i64: 2, 6>}]} {
    %c0 = arith.constant 0 : index
    %c0_0 = arith.constant 0 : index
    %0 = vector.load %arg2[%c0, %c0_0] : memref<576x64xbf16, #tpu.memory_space<vmem>>, vector<576x64xbf16>
    %c0_1 = arith.constant 0 : index
    %c0_2 = arith.constant 0 : index
    %1 = vector.load %arg3[%c0_1, %c0_2] : memref<1x64xf32, #tpu.memory_space<vmem>>, vector<1x64xf32>
    %cst = arith.constant 0.000000e+00 : f32
    %2 = vector.broadcast %cst : f32 to vector<2x512xf32>
    %c0_3 = arith.constant 0 : index
    %c0_4 = arith.constant 0 : index
    %c0_5 = arith.constant 0 : index
    %3 = vector.load %arg1[%c0_3, %c0_4, %c0_5] : memref<4x2x576xbf16, #tpu.memory_space<vmem>>, vector<1x2x576xbf16>
    %4 = vector.shape_cast %3 : vector<1x2x576xbf16> to vector<2x576xbf16>
    %cst_6 = arith.constant dense<0.000000e+00> : vector<2x64xf32>
    %5 = tpu.matmul %4, %0, %cst_6 {dimension_numbers = #tpu.dot_dimension_numbers<[1], [0], [0], [1], [0, 0, 1, 1], [], []>} : vector<2x576xbf16>, vector<576x64xbf16>, vector<2x64xf32> -> vector<2x64xf32>
    %6 = vector.broadcast %1 : vector<1x64xf32> to vector<2x64xf32>
    %7 = arith.addf %5, %6 : vector<2x64xf32>
    %cst_7 = arith.constant 0.000000e+00 : f32
    %8 = vector.broadcast %cst_7 : f32 to vector<2x64xf32>
    %9 = arith.maximumf %7, %8 : vector<2x64xf32>
    %10 = arith.truncf %9 : vector<2x64xf32> to vector<2x64xbf16>
    %c0_8 = arith.constant 0 : index
    %c0_9 = arith.constant 0 : index
    %c0_10 = arith.constant 0 : index
    %11 = vector.load %arg4[%c0_8, %c0_9, %c0_10] : memref<4x64x512xbf16, #tpu.memory_space<vmem>>, vector<1x64x512xbf16>
    %12 = vector.shape_cast %11 : vector<1x64x512xbf16> to vector<64x512xbf16>
    %cst_11 = arith.constant dense<0.000000e+00> : vector<2x512xf32>
    %13 = tpu.matmul %10, %12, %cst_11 {dimension_numbers = #tpu.dot_dimension_numbers<[1], [0], [0], [1], [0, 0, 1, 1], [], []>} : vector<2x64xbf16>, vector<64x512xbf16>, vector<2x512xf32> -> vector<2x512xf32>
    %14 = arith.addf %2, %13 : vector<2x512xf32>
    %c1 = arith.constant 1 : index
    %c0_12 = arith.constant 0 : index
    %c0_13 = arith.constant 0 : index
    %15 = vector.load %arg1[%c1, %c0_12, %c0_13] : memref<4x2x576xbf16, #tpu.memory_space<vmem>>, vector<1x2x576xbf16>
    %16 = vector.shape_cast %15 : vector<1x2x576xbf16> to vector<2x576xbf16>
    %cst_14 = arith.constant dense<0.000000e+00> : vector<2x64xf32>
    %17 = tpu.matmul %16, %0, %cst_14 {dimension_numbers = #tpu.dot_dimension_numbers<[1], [0], [0], [1], [0, 0, 1, 1], [], []>} : vector<2x576xbf16>, vector<576x64xbf16>, vector<2x64xf32> -> vector<2x64xf32>
    %18 = vector.broadcast %1 : vector<1x64xf32> to vector<2x64xf32>
    %19 = arith.addf %17, %18 : vector<2x64xf32>
    %cst_15 = arith.constant 0.000000e+00 : f32
    %20 = vector.broadcast %cst_15 : f32 to vector<2x64xf32>
    %21 = arith.maximumf %19, %20 : vector<2x64xf32>
    %22 = arith.truncf %21 : vector<2x64xf32> to vector<2x64xbf16>
    %c1_16 = arith.constant 1 : index
    %c0_17 = arith.constant 0 : index
    %c0_18 = arith.constant 0 : index
    %23 = vector.load %arg4[%c1_16, %c0_17, %c0_18] : memref<4x64x512xbf16, #tpu.memory_space<vmem>>, vector<1x64x512xbf16>
    %24 = vector.shape_cast %23 : vector<1x64x512xbf16> to vector<64x512xbf16>
    %cst_19 = arith.constant dense<0.000000e+00> : vector<2x512xf32>
    %25 = tpu.matmul %22, %24, %cst_19 {dimension_numbers = #tpu.dot_dimension_numbers<[1], [0], [0], [1], [0, 0, 1, 1], [], []>} : vector<2x64xbf16>, vector<64x512xbf16>, vector<2x512xf32> -> vector<2x512xf32>
    %26 = arith.addf %14, %25 : vector<2x512xf32>
    %c2 = arith.constant 2 : index
    %c0_20 = arith.constant 0 : index
    %c0_21 = arith.constant 0 : index
    %27 = vector.load %arg1[%c2, %c0_20, %c0_21] : memref<4x2x576xbf16, #tpu.memory_space<vmem>>, vector<1x2x576xbf16>
    %28 = vector.shape_cast %27 : vector<1x2x576xbf16> to vector<2x576xbf16>
    %cst_22 = arith.constant dense<0.000000e+00> : vector<2x64xf32>
    %29 = tpu.matmul %28, %0, %cst_22 {dimension_numbers = #tpu.dot_dimension_numbers<[1], [0], [0], [1], [0, 0, 1, 1], [], []>} : vector<2x576xbf16>, vector<576x64xbf16>, vector<2x64xf32> -> vector<2x64xf32>
    %30 = vector.broadcast %1 : vector<1x64xf32> to vector<2x64xf32>
    %31 = arith.addf %29, %30 : vector<2x64xf32>
    %cst_23 = arith.constant 0.000000e+00 : f32
    %32 = vector.broadcast %cst_23 : f32 to vector<2x64xf32>
    %33 = arith.maximumf %31, %32 : vector<2x64xf32>
    %34 = arith.truncf %33 : vector<2x64xf32> to vector<2x64xbf16>
    %c2_24 = arith.constant 2 : index
    %c0_25 = arith.constant 0 : index
    %c0_26 = arith.constant 0 : index
    %35 = vector.load %arg4[%c2_24, %c0_25, %c0_26] : memref<4x64x512xbf16, #tpu.memory_space<vmem>>, vector<1x64x512xbf16>
    %36 = vector.shape_cast %35 : vector<1x64x512xbf16> to vector<64x512xbf16>
    %cst_27 = arith.constant dense<0.000000e+00> : vector<2x512xf32>
    %37 = tpu.matmul %34, %36, %cst_27 {dimension_numbers = #tpu.dot_dimension_numbers<[1], [0], [0], [1], [0, 0, 1, 1], [], []>} : vector<2x64xbf16>, vector<64x512xbf16>, vector<2x512xf32> -> vector<2x512xf32>
    %38 = arith.addf %26, %37 : vector<2x512xf32>
    %c3 = arith.constant 3 : index
    %c0_28 = arith.constant 0 : index
    %c0_29 = arith.constant 0 : index
    %39 = vector.load %arg1[%c3, %c0_28, %c0_29] : memref<4x2x576xbf16, #tpu.memory_space<vmem>>, vector<1x2x576xbf16>
    %40 = vector.shape_cast %39 : vector<1x2x576xbf16> to vector<2x576xbf16>
    %cst_30 = arith.constant dense<0.000000e+00> : vector<2x64xf32>
    %41 = tpu.matmul %40, %0, %cst_30 {dimension_numbers = #tpu.dot_dimension_numbers<[1], [0], [0], [1], [0, 0, 1, 1], [], []>} : vector<2x576xbf16>, vector<576x64xbf16>, vector<2x64xf32> -> vector<2x64xf32>
    %42 = vector.broadcast %1 : vector<1x64xf32> to vector<2x64xf32>
    %43 = arith.addf %41, %42 : vector<2x64xf32>
    %cst_31 = arith.constant 0.000000e+00 : f32
    %44 = vector.broadcast %cst_31 : f32 to vector<2x64xf32>
    %45 = arith.maximumf %43, %44 : vector<2x64xf32>
    %46 = arith.truncf %45 : vector<2x64xf32> to vector<2x64xbf16>
    %c3_32 = arith.constant 3 : index
    %c0_33 = arith.constant 0 : index
    %c0_34 = arith.constant 0 : index
    %47 = vector.load %arg4[%c3_32, %c0_33, %c0_34] : memref<4x64x512xbf16, #tpu.memory_space<vmem>>, vector<1x64x512xbf16>
    %48 = vector.shape_cast %47 : vector<1x64x512xbf16> to vector<64x512xbf16>
    %cst_35 = arith.constant dense<0.000000e+00> : vector<2x512xf32>
    %49 = tpu.matmul %46, %48, %cst_35 {dimension_numbers = #tpu.dot_dimension_numbers<[1], [0], [0], [1], [0, 0, 1, 1], [], []>} : vector<2x64xbf16>, vector<64x512xbf16>, vector<2x512xf32> -> vector<2x512xf32>
    %50 = arith.addf %38, %49 : vector<2x512xf32>
    %c0_36 = arith.constant 0 : index
    %c0_37 = arith.constant 0 : index
    %51 = vector.load %arg5[%c0_36, %c0_37] : memref<1x512xf32, #tpu.memory_space<vmem>>, vector<1x512xf32>
    %52 = vector.broadcast %51 : vector<1x512xf32> to vector<2x512xf32>
    %53 = arith.addf %50, %52 : vector<2x512xf32>
    %cst_38 = arith.constant 0.000000e+00 : f32
    %54 = vector.broadcast %cst_38 : f32 to vector<2x512xf32>
    %55 = arith.maximumf %53, %54 : vector<2x512xf32>
    %56 = arith.truncf %55 : vector<2x512xf32> to vector<2x512xbf16>
    %c0_39 = arith.constant 0 : index
    %c0_40 = arith.constant 0 : index
    %57 = vector.load %arg6[%c0_39, %c0_40] : memref<512x6xbf16, #tpu.memory_space<vmem>>, vector<512x6xbf16>
    %cst_41 = arith.constant dense<0.000000e+00> : vector<2x6xf32>
    %58 = tpu.matmul %56, %57, %cst_41 {dimension_numbers = #tpu.dot_dimension_numbers<[1], [0], [0], [1], [0, 0, 1, 1], [], []>} : vector<2x512xbf16>, vector<512x6xbf16>, vector<2x6xf32> -> vector<2x6xf32>
    %c0_42 = arith.constant 0 : index
    %c0_43 = arith.constant 0 : index
    %59 = vector.load %arg7[%c0_42, %c0_43] : memref<1x6xf32, #tpu.memory_space<vmem>>, vector<1x6xf32>
    %60 = vector.broadcast %59 : vector<1x6xf32> to vector<2x6xf32>
    %61 = arith.addf %58, %60 : vector<2x6xf32>
    %c0_44 = arith.constant 0 : index
    %c0_45 = arith.constant 0 : index
    %62 = vector.load %arg8[%c0_44, %c0_45] : memref<2x6xf32, #tpu.memory_space<vmem>>, vector<2x6xf32>
    tpu.vector_store %arg8[%c0_44, %c0_45], %61 {strides = array<i32>} : memref<2x6xf32, #tpu.memory_space<vmem>>, vector<2x6xf32>,
    return
  }
  func.func @transform_0(%arg0: i32) -> (i32, i32, i32) {
    %c0_i32 = arith.constant 0 : i32
    %c0_i32_0 = arith.constant 0 : i32
    %c0_i32_1 = arith.constant 0 : i32
    return %c0_i32, %arg0, %c0_i32_0 : i32, i32, i32
  }
  func.func @transform_1(%arg0: i32) -> (i32, i32) {
    %c0_i32 = arith.constant 0 : i32
    %c0_i32_0 = arith.constant 0 : i32
    %c0_i32_1 = arith.constant 0 : i32
    return %c0_i32, %c0_i32_0 : i32, i32
  }
  func.func @transform_2(%arg0: i32) -> (i32, i32) {
    %c0_i32 = arith.constant 0 : i32
    %c0_i32_0 = arith.constant 0 : i32
    %c0_i32_1 = arith.constant 0 : i32
    return %c0_i32, %c0_i32_0 : i32, i32
  }
  func.func @transform_3(%arg0: i32) -> (i32, i32, i32) {
    %c0_i32 = arith.constant 0 : i32
    %c0_i32_0 = arith.constant 0 : i32
    %c0_i32_1 = arith.constant 0 : i32
    %c0_i32_2 = arith.constant 0 : i32
    return %c0_i32, %c0_i32_0, %c0_i32_1 : i32, i32, i32
  }
  func.func @transform_4(%arg0: i32) -> (i32, i32) {
    %c0_i32 = arith.constant 0 : i32
    %c0_i32_0 = arith.constant 0 : i32
    %c0_i32_1 = arith.constant 0 : i32
    return %c0_i32, %c0_i32_0 : i32, i32
  }
  func.func @transform_5(%arg0: i32) -> (i32, i32) {
    %c0_i32 = arith.constant 0 : i32
    %c0_i32_0 = arith.constant 0 : i32
    %c0_i32_1 = arith.constant 0 : i32
    return %c0_i32, %c0_i32_0 : i32, i32
  }
  func.func @transform_6(%arg0: i32) -> (i32, i32) {
    %c0_i32 = arith.constant 0 : i32
    %c0_i32_0 = arith.constant 0 : i32
    %c0_i32_1 = arith.constant 0 : i32
    return %c0_i32, %c0_i32_0 : i32, i32
  }
  func.func @transform_7(%arg0: i32) -> (i32, i32) {
    %c0_i32 = arith.constant 0 : i32
    %c0_i32_0 = arith.constant 0 : i32
    return %arg0, %c0_i32 : i32, i32
  }
}

</mosaic_0001>

<bundles_post_ra>
// kernel: mnih2015_forward.3
= control target key start
LH: loop header
LB: loop body
LE: loop exit
PB: predicated region body
PF: predicated region fallthrough
CT: control target
= control target key end

     0   :  { %vm463_vm0 = vcmask 261120   ;;  %s973_s1 = inlined_call_operand.vmem [shape: bf16[256,32], index: 1, kind: input, shape index: {}]   ;;  %s974_s0 = inlined_call_operand.vmem [shape: bf16[200,256], index: 0, kind: input, shape index: {}]   ;;  %s975_s2 = inlined_call_operand.vmem [shape: f32[1,32], index: 2, kind: input, shape index: {}]   ;;  %s976_s3 = inlined_call_operand.vmem [shape: f32[200,32], index: 3, kind: output, shape index: {}]  }
   0x1   :  { %v646_v0 = vld [vmem:[%s973_s1 + $0x78] sm:$0xff]   ;;  %v648_v2 = vld [vmem:[%s973_s1 + $0x70] sm:$0xff]   ;;  %v650_v4 = vld [vmem:[%s973_s1 + $0x68] sm:$0xff]  }
   0x2   :  { %v647_v1 = vld [vmem:[%s973_s1 + $0x38] sm:$0xff]   ;;  %536 = vmatprep.subr.bf16.mxu0 %v646_v0  ;;  %630 = vmatprep.subr.bf16.mxu1 %v646_v0  ;;  %v649_v3 = vld [vmem:[%s973_s1 + $0x30] sm:$0xff]   ;;  %v651_v5 = vld [vmem:[%s973_s1 + $0x28] sm:$0xff]  }
   0x3   :  { %537 = vmatpush3.bf16.msra.mxu0 %v647_v1  ;;  %638 = vmatpush3.bf16.msra.mxu1 %v647_v1  ;;  %v652_v6 = vld [vmem:[%s973_s1 + $0x60] sm:$0xff]   ;;  %v654_v8 = vld [vmem:[%s973_s1 + $0x58] sm:$0xff]   ;;  %v656_v10 = vld [vmem:[%s973_s1 + $0x50] sm:$0xff]  }
   0x4   :  { %538 = vmatprep.subr.bf16.mxu0 %v648_v2  ;;  %631 = vmatprep.subr.bf16.mxu1 %v648_v2  ;;  %v653_v7 = vld [vmem:[%s973_s1 + $0x20] sm:$0xff]   ;;  %v655_v9 = vld [vmem:[%s973_s1 + $0x18] sm:$0xff]   ;;  %v657_v13 = vld [vmem:[%s973_s1 + $0x10] sm:$0xff]  }
   0x5   :  { %v664_v11 = vld [vmem:[%s974_s0 + $0x4] ss:$8 sps:$4 sm:$0xff]   ;;  %v667_v12 = vld [vmem:[%s974_s0 + $0x74] ss:$8 sps:$4 sm:$0xff]   ;;  %v662_v18 = vld [vmem:[%s974_s0] ss:$8 sps:$4 sm:$0xff]  }
   0x6   :  { %v658_v14 = vld [vmem:[%s973_s1 + $0x48] sm:$0xff]   ;;  %334 = vmatprep.mubr.bf16.mxu0 %v664_v11  ;;  %390 = vmatprep.mubr.bf16.mxu1 %v667_v12  ;;  %v660_v16 = vld [vmem:[%s973_s1 + $0x40] sm:$0xff]   ;;  %v665_v19 = vld [vmem:[%s974_s0 + $0x70] ss:$8 sps:$4 sm:$0xff]  }
   0x7   :  { %539 = vmatpush3.bf16.msra.mxu0 %v649_v3  ;;  %639 = vmatpush3.bf16.msra.mxu1 %v649_v3  ;;  %v659_v15 = vld [vmem:[%s973_s1 + $0x8] sm:$0xff]   ;;  %v661_v17 = vld [vmem:[%s973_s1] sm:$0xff]   ;;  %v668_v20 = vld [vmem:[%s974_s0 + $0x14] ss:$8 sps:$4 sm:$0xff]  }
   0x8   :  { %540 = vmatprep.subr.bf16.mxu0 %v650_v4  ;;  %632 = vmatprep.subr.bf16.mxu1 %v650_v4  ;;  %v671_v21 = vld [vmem:[%s974_s0 + $0x84] ss:$8 sps:$4 sm:$0xff]   ;;  %v670_v22 = vld [vmem:[%s974_s0 + $0x10] ss:$8 sps:$4 sm:$0xff]   ;;  %v673_v23 = vld [vmem:[%s974_s0 + $0x80] ss:$8 sps:$4 sm:$0xff]  }
   0x9   :  { %v674_v24 = vld [vmem:[%s974_s0 + $0x24] ss:$8 sps:$4 sm:$0xff]   ;;  %v677_v25 = vld [vmem:[%s974_s0 + $0x94] ss:$8 sps:$4 sm:$0xff]   ;;  %v676_v26 = vld [vmem:[%s974_s0 + $0x20] ss:$8 sps:$4 sm:$0xff]  }
   0xa   :  { %v679_v27 = vld [vmem:[%s974_s0 + $0x90] ss:$8 sps:$4 sm:$0xff]   ;;  %v680_v28 = vld [vmem:[%s974_s0 + $0x34] ss:$8 sps:$4 sm:$0xff]   ;;  %v683_v29 = vld [vmem:[%s974_s0 + $0xa4] ss:$8 sps:$4 sm:$0xff]  }
   0xb   :  { %541 = vmatpush3.bf16.msra.mxu0 %v651_v5  ;;  %640 = vmatpush3.bf16.msra.mxu1 %v651_v5  ;;  %v682_v30 = vld [vmem:[%s974_s0 + $0x30] ss:$8 sps:$4 sm:$0xff]   ;;  %v685_v31 = vld [vmem:[%s974_s0 + $0xa0] ss:$8 sps:$4 sm:$0xff]   ;;  %v686_v32 = vld [vmem:[%s974_s0 + $0x44] ss:$8 sps:$4 sm:$0xff]  }
   0xc   :  { %542 = vmatprep.subr.bf16.mxu0 %v652_v6  ;;  %633 = vmatprep.subr.bf16.mxu1 %v652_v6  ;;  %v689_v33 = vld [vmem:[%s974_s0 + $0xb4] ss:$8 sps:$4 sm:$0xff]   ;;  %v39_v34 = vld [vmem:[%s974_s0 + $0xc0] sm:$0xff]  ;;  %v691_v36 = vld [vmem:[%s974_s0 + $0xb0] ss:$8 sps:$4 sm:$0xff]  }
   0xd   :  { %v688_v35 = vld [vmem:[%s974_s0 + $0x40] ss:$8 sps:$4 sm:$0xff]   ;;  %v692_v37 = vld [vmem:[%s974_s0 + $0x54] ss:$8 sps:$4 sm:$0xff]   ;;  %v519_v38 = vcombine.high %v39_v34, %v39_v34  ;;  %v694_v39 = vld [vmem:[%s974_s0 + $0x50] ss:$8 sps:$4 sm:$0xff]   ;;  %v518_v40 = vcombine.low %v39_v34, %v39_v34 }
   0xe   :  { %v697_v41 = vld [vmem:[%s974_s0 + $0x64] ss:$8 sps:$4 sm:$0xff]   ;;  %v699_v42 = vld [vmem:[%s974_s0 + $0x60] ss:$8 sps:$4 sm:$0xff]  }
   0xf   :  { %543 = vmatpush3.bf16.msra.mxu0 %v653_v7  ;;  %641 = vmatpush3.bf16.msra.mxu1 %v653_v7  ;;  %v846_v45 = vld [vmem:[%s975_s2] ss:$0 sm:$0xff] }
  0x10   :  { %544 = vmatprep.subr.bf16.mxu0 %v654_v8  ;;  %634 = vmatprep.subr.bf16.mxu1 %v654_v8 }
  0x13   :  { %545 = vmatpush3.bf16.msra.mxu0 %v655_v9  ;;  %642 = vmatpush3.bf16.msra.mxu1 %v655_v9 }
  0x14   :  { %546 = vmatprep.subr.bf16.mxu0 %v656_v10  ;;  %635 = vmatprep.subr.bf16.mxu1 %v656_v10 }
  0x17   :  { %547 = vmatpush3.bf16.msra.mxu0 %v657_v13  ;;  %643 = vmatpush3.bf16.msra.mxu1 %v657_v13 }
  0x18   :  { %548 = vmatprep.subr.bf16.mxu0 %v658_v14  ;;  %636 = vmatprep.subr.bf16.mxu1 %v658_v14 }
  0x1b   :  { %549 = vmatpush3.bf16.msra.mxu0 %v659_v15  ;;  %644 = vmatpush3.bf16.msra.mxu1 %v659_v15 }
  0x1c   :  { %550 = vmatprep.subr.bf16.mxu0 %v660_v16  ;;  %637 = vmatprep.subr.bf16.mxu1 %v660_v16 }
  0x1f   :  { %551 = vmatpush3.bf16.msra.mxu0 %v661_v17  ;;  %645 = vmatpush3.bf16.msra.mxu1 %v661_v17 }
  0x22   :  { %335 = vmatmul.mubr.bf16.vlgmr.msra.gmra.mxu0 %v662_v18  ;;  %391 = vmatmul.mubr.bf16.vlgmr.msra.gmra.mxu1 %v665_v19 }
  0x23   :  { %342 = vmatprep.mubr.bf16.mxu0 %v668_v20  ;;  %398 = vmatprep.mubr.bf16.mxu1 %v671_v21 }
  0x2a   :  { %343 = vmatmul.mubr.bf16.gmra.mxu0 %v670_v22  ;;  %399 = vmatmul.mubr.bf16.gmra.mxu1 %v673_v23 }
  0x2b   :  { %350 = vmatprep.mubr.bf16.mxu0 %v674_v24  ;;  %406 = vmatprep.mubr.bf16.mxu1 %v677_v25 }
  0x32   :  { %351 = vmatmul.mubr.bf16.gmra.mxu0 %v676_v26  ;;  %407 = vmatmul.mubr.bf16.gmra.mxu1 %v679_v27 }
  0x33   :  { %358 = vmatprep.mubr.bf16.mxu0 %v680_v28  ;;  %414 = vmatprep.mubr.bf16.mxu1 %v683_v29 }
  0x3a   :  { %359 = vmatmul.mubr.bf16.gmra.mxu0 %v682_v30  ;;  %415 = vmatmul.mubr.bf16.gmra.mxu1 %v685_v31 }
  0x3b   :  { %366 = vmatprep.mubr.bf16.mxu0 %v686_v32  ;;  %422 = vmatprep.mubr.bf16.mxu1 %v689_v33 }
  0x42   :  { %367 = vmatmul.mubr.bf16.gmra.mxu0 %v688_v35  ;;  %423 = vmatmul.mubr.bf16.gmra.mxu1 %v691_v36 }
  0x43   :  { %374 = vmatprep.mubr.bf16.mxu0 %v692_v37  ;;  %430 = vmatprep.mubr.bf16.mxu1 %v519_v38 }
  0x4a   :  { %375 = vmatmul.mubr.bf16.gmra.mxu0 %v694_v39  ;;  %431 = vmatmul.mubr.bf16.gmra.mxu1 %v518_v40 }
  0x4b   :  { %382 = vmatprep.mubr.bf16.mxu0 %v697_v41 }
  0x52   :  { %383 = vmatmul.mubr.bf16.gmra.mxu0 %v699_v42 }
  0xe2   :  { %v552_v43 = vpop.f32.mrf.mxu0  ;;  %v594_v44 = vpop.f32.mrf.mxu1 }
  0xe4   :  { %v553_v46 = vpop.f32.mrf.mxu0  ;;  %v595_v47 = vpop.f32.mrf.mxu1 }
  0xe5   :  { %v554_v48 = vadd.f32 %v553_v46, %v552_v43  ;;  %v596_v49 = vadd.f32 %v595_v47, %v594_v44 }
  0xe6   :  { %v555_v50 = vpop.f32.mrf.mxu0  ;;  %v597_v51 = vpop.f32.mrf.mxu1 }
  0xe7   :  { %v337_v52 = vadd.f32 %v554_v48, %v846_v45  ;;  %v393_v53 = vadd.f32 %v596_v49, %v846_v45 }
  0xe8   :  { %v556_v54 = vpop.f32.mrf.mxu0  ;;  %v598_v55 = vpop.f32.mrf.mxu1 }
  0xe9   :  { %v438_v56 = vmax.f32 %v337_v52, 0.0  ;;  %v557_v57 = vadd.f32 %v556_v54, %v555_v50  ;;  %v452_v58 = vmax.f32 %v393_v53, 0.0  ;;  %v599_v59 = vadd.f32 %v598_v55, %v597_v51 }
  0xea   :  { %v558_v60 = vpop.f32.mrf.mxu0  ;;  %v600_v61 = vpop.f32.mrf.mxu1 }
  0xeb   :  { %464 = vst.msk [vmem:[%s976_s3] sm:$0xff] %vm463_vm0, %v438_v56  ;;  %v340_v62 = vadd.f32 %v557_v57, %v846_v45  ;;  %478 = vst.msk [vmem:[%s976_s3 + $0x70] sm:$0xff] %vm463_vm0, %v452_v58  ;;  %v396_v63 = vadd.f32 %v599_v59, %v846_v45 }
  0xec   :  { %v559_v0 = vpop.f32.mrf.mxu0  ;;  %v601_v1 = vpop.f32.mrf.mxu1 }
  0xed   :  { %v439_v2 = vmax.f32 %v340_v62, 0.0  ;;  %v560_v3 = vadd.f32 %v559_v0, %v558_v60  ;;  %v453_v4 = vmax.f32 %v396_v63, 0.0  ;;  %v602_v5 = vadd.f32 %v601_v1, %v600_v61 }
  0xee   :  { %v561_v6 = vpop.f32.mrf.mxu0  ;;  %v603_v7 = vpop.f32.mrf.mxu1 }
  0xef   :  { %465 = vst.msk [vmem:[%s976_s3 + $0x8] sm:$0xff] %vm463_vm0, %v439_v2  ;;  %v345_v8 = vadd.f32 %v560_v3, %v846_v45  ;;  %479 = vst.msk [vmem:[%s976_s3 + $0x78] sm:$0xff] %vm463_vm0, %v453_v4  ;;  %v401_v9 = vadd.f32 %v602_v5, %v846_v45 }
  0xf0   :  { %v562_v10 = vpop.f32.mrf.mxu0  ;;  %v604_v11 = vpop.f32.mrf.mxu1 }
  0xf1   :  { %v440_v12 = vmax.f32 %v345_v8, 0.0  ;;  %v563_v13 = vadd.f32 %v562_v10, %v561_v6  ;;  %v454_v14 = vmax.f32 %v401_v9, 0.0  ;;  %v605_v15 = vadd.f32 %v604_v11, %v603_v7 }
  0xf2   :  { %v564_v16 = vpop.f32.mrf.mxu0  ;;  %v606_v17 = vpop.f32.mrf.mxu1 }
  0xf3   :  { %466 = vst.msk [vmem:[%s976_s3 + $0x10] sm:$0xff] %vm463_vm0, %v440_v12  ;;  %v348_v18 = vadd.f32 %v563_v13, %v846_v45  ;;  %480 = vst.msk [vmem:[%s976_s3 + $0x80] sm:$0xff] %vm463_vm0, %v454_v14  ;;  %v404_v19 = vadd.f32 %v605_v15, %v846_v45 }
  0xf4   :  { %v565_v20 = vpop.f32.mrf.mxu0  ;;  %v607_v21 = vpop.f32.mrf.mxu1 }
  0xf5   :  { %v441_v22 = vmax.f32 %v348_v18, 0.0  ;;  %v566_v23 = vadd.f32 %v565_v20, %v564_v16  ;;  %v455_v24 = vmax.f32 %v404_v19, 0.0  ;;  %v608_v25 = vadd.f32 %v607_v21, %v606_v17 }
  0xf6   :  { %v567_v26 = vpop.f32.mrf.mxu0  ;;  %v609_v27 = vpop.f32.mrf.mxu1 }
  0xf7   :  { %467 = vst.msk [vmem:[%s976_s3 + $0x18] sm:$0xff] %vm463_vm0, %v441_v22  ;;  %v353_v28 = vadd.f32 %v566_v23, %v846_v45  ;;  %481 = vst.msk [vmem:[%s976_s3 + $0x88] sm:$0xff] %vm463_vm0, %v455_v24  ;;  %v409_v29 = vadd.f32 %v608_v25, %v846_v45 }
  0xf8   :  { %v568_v30 = vpop.f32.mrf.mxu0  ;;  %v610_v31 = vpop.f32.mrf.mxu1 }
  0xf9   :  { %v442_v32 = vmax.f32 %v353_v28, 0.0  ;;  %v569_v33 = vadd.f32 %v568_v30, %v567_v26  ;;  %v456_v34 = vmax.f32 %v409_v29, 0.0  ;;  %v611_v35 = vadd.f32 %v610_v31, %v609_v27 }
  0xfa   :  { %v570_v36 = vpop.f32.mrf.mxu0  ;;  %v612_v37 = vpop.f32.mrf.mxu1 }
  0xfb   :  { %468 = vst.msk [vmem:[%s976_s3 + $0x20] sm:$0xff] %vm463_vm0, %v442_v32  ;;  %v356_v38 = vadd.f32 %v569_v33, %v846_v45  ;;  %482 = vst.msk [vmem:[%s976_s3 + $0x90] sm:$0xff] %vm463_vm0, %v456_v34  ;;  %v412_v39 = vadd.f32 %v611_v35, %v846_v45 }
  0xfc   :  { %v571_v40 = vpop.f32.mrf.mxu0  ;;  %v613_v41 = vpop.f32.mrf.mxu1 }
  0xfd   :  { %v443_v42 = vmax.f32 %v356_v38, 0.0  ;;  %v572_v43 = vadd.f32 %v571_v40, %v570_v36  ;;  %v457_v44 = vmax.f32 %v412_v39, 0.0  ;;  %v614_v46 = vadd.f32 %v613_v41, %v612_v37 }
  0xfe   :  { %v573_v47 = vpop.f32.mrf.mxu0  ;;  %v615_v48 = vpop.f32.mrf.mxu1 }
  0xff   :  { %469 = vst.msk [vmem:[%s976_s3 + $0x28] sm:$0xff] %vm463_vm0, %v443_v42  ;;  %v361_v49 = vadd.f32 %v572_v43, %v846_v45  ;;  %483 = vst.msk [vmem:[%s976_s3 + $0x98] sm:$0xff] %vm463_vm0, %v457_v44  ;;  %v417_v50 = vadd.f32 %v614_v46, %v846_v45 }
 0x100   :  { %v574_v51 = vpop.f32.mrf.mxu0  ;;  %v616_v52 = vpop.f32.mrf.mxu1 }
 0x101   :  { %v444_v53 = vmax.f32 %v361_v49, 0.0  ;;  %v575_v54 = vadd.f32 %v574_v51, %v573_v47  ;;  %v458_v55 = vmax.f32 %v417_v50, 0.0  ;;  %v617_v56 = vadd.f32 %v616_v52, %v615_v48 }
 0x102   :  { %v576_v57 = vpop.f32.mrf.mxu0  ;;  %v618_v58 = vpop.f32.mrf.mxu1 }
 0x103   :  { %470 = vst.msk [vmem:[%s976_s3 + $0x30] sm:$0xff] %vm463_vm0, %v444_v53  ;;  %v364_v59 = vadd.f32 %v575_v54, %v846_v45  ;;  %484 = vst.msk [vmem:[%s976_s3 + $0xa0] sm:$0xff] %vm463_vm0, %v458_v55  ;;  %v420_v60 = vadd.f32 %v617_v56, %v846_v45 }
 0x104   :  { %v577_v61 = vpop.f32.mrf.mxu0  ;;  %v619_v62 = vpop.f32.mrf.mxu1 }
 0x105   :  { %v445_v63 = vmax.f32 %v364_v59, 0.0  ;;  %v578_v0 = vadd.f32 %v577_v61, %v576_v57  ;;  %v459_v1 = vmax.f32 %v420_v60, 0.0  ;;  %v620_v2 = vadd.f32 %v619_v62, %v618_v58 }
 0x106   :  { %v579_v3 = vpop.f32.mrf.mxu0  ;;  %v621_v4 = vpop.f32.mrf.mxu1 }
 0x107   :  { %471 = vst.msk [vmem:[%s976_s3 + $0x38] sm:$0xff] %vm463_vm0, %v445_v63  ;;  %v369_v5 = vadd.f32 %v578_v0, %v846_v45  ;;  %485 = vst.msk [vmem:[%s976_s3 + $0xa8] sm:$0xff] %vm463_vm0, %v459_v1  ;;  %v425_v6 = vadd.f32 %v620_v2, %v846_v45 }
 0x108   :  { %v580_v7 = vpop.f32.mrf.mxu0  ;;  %v622_v8 = vpop.f32.mrf.mxu1 }
 0x109   :  { %v446_v9 = vmax.f32 %v369_v5, 0.0  ;;  %v581_v10 = vadd.f32 %v580_v7, %v579_v3  ;;  %v460_v11 = vmax.f32 %v425_v6, 0.0  ;;  %v623_v12 = vadd.f32 %v622_v8, %v621_v4 }
 0x10a   :  { %v582_v13 = vpop.f32.mrf.mxu0  ;;  %v624_v14 = vpop.f32.mrf.mxu1 }
 0x10b   :  { %472 = vst.msk [vmem:[%s976_s3 + $0x40] sm:$0xff] %vm463_vm0, %v446_v9  ;;  %v372_v15 = vadd.f32 %v581_v10, %v846_v45  ;;  %486 = vst.msk [vmem:[%s976_s3 + $0xb0] sm:$0xff] %vm463_vm0, %v460_v11  ;;  %v428_v16 = vadd.f32 %v623_v12, %v846_v45 }
 0x10c   :  { %v583_v17 = vpop.f32.mrf.mxu0  ;;  %v625_v18 = vpop.f32.mrf.mxu1 }
 0x10d   :  { %v447_v19 = vmax.f32 %v372_v15, 0.0  ;;  %v584_v20 = vadd.f32 %v583_v17, %v582_v13  ;;  %v461_v21 = vmax.f32 %v428_v16, 0.0  ;;  %v626_v22 = vadd.f32 %v625_v18, %v624_v14 }
 0x10e   :  { %v585_v23 = vpop.f32.mrf.mxu0  ;;  %v627_v24 = vpop.f32.mrf.mxu1 }
 0x10f   :  { %473 = vst.msk [vmem:[%s976_s3 + $0x48] sm:$0xff] %vm463_vm0, %v447_v19  ;;  %v377_v25 = vadd.f32 %v584_v20, %v846_v45  ;;  %487 = vst.msk [vmem:[%s976_s3 + $0xb8] sm:$0xff] %vm463_vm0, %v461_v21  ;;  %v433_v26 = vadd.f32 %v626_v22, %v846_v45 }
 0x110   :  { %v586_v27 = vpop.f32.mrf.mxu0  ;;  %v628_v28 = vpop.f32.mrf.mxu1 }
 0x111   :  { %v448_v29 = vmax.f32 %v377_v25, 0.0  ;;  %v587_v30 = vadd.f32 %v586_v27, %v585_v23  ;;  %v462_v31 = vmax.f32 %v433_v26, 0.0 }
 0x112   :  { %v588_v32 = vpop.f32.mrf.mxu0 }
 0x113   :  { %474 = vst.msk [vmem:[%s976_s3 + $0x50] sm:$0xff] %vm463_vm0, %v448_v29  ;;  %v380_v33 = vadd.f32 %v587_v30, %v846_v45  ;;  %488 = vst.msk [vmem:[%s976_s3 + $0xc0] sm:$0xff] %vm463_vm0, %v462_v31 }
 0x114   :  { %v589_v34 = vpop.f32.mrf.mxu0 }
 0x115   :  { %v449_v35 = vmax.f32 %v380_v33, 0.0  ;;  %v590_v36 = vadd.f32 %v589_v34, %v588_v32 }
 0x116   :  { %v591_v37 = vpop.f32.mrf.mxu0 }
 0x117   :  { %475 = vst.msk [vmem:[%s976_s3 + $0x58] sm:$0xff] %vm463_vm0, %v449_v35  ;;  %v385_v38 = vadd.f32 %v590_v36, %v846_v45 }
 0x118   :  { %v592_v39 = vpop.f32.mrf.mxu0 }
 0x119   :  { %v450_v40 = vmax.f32 %v385_v38, 0.0  ;;  %v593_v41 = vadd.f32 %v592_v39, %v591_v37 }
 0x11b   :  { %476 = vst.msk [vmem:[%s976_s3 + $0x60] sm:$0xff] %vm463_vm0, %v450_v40  ;;  %v388_v42 = vadd.f32 %v593_v41, %v846_v45 }
 0x11d   :  { %v451_v43 = vmax.f32 %v388_v42, 0.0 }
 0x11f   :  { %477 = vst.msk [vmem:[%s976_s3 + $0x68] sm:$0xff] %vm463_vm0, %v451_v43 }

// kernel: mnih2015_forward.4
= control target key start
LH: loop header
LB: loop body
LE: loop exit
PB: predicated region body
PF: predicated region fallthrough
CT: control target
= control target key end

     0   :  { %vm428_vm0 = vcmask 523264   ;;  %s737_s1 = inlined_call_operand.vmem [shape: bf16[512,64], index: 1, kind: input, shape index: {}]   ;;  %s738_s0 = inlined_call_operand.vmem [shape: bf16[32,512], index: 0, kind: input, shape index: {}]   ;;  %s739_s2 = inlined_call_operand.vmem [shape: f32[1,64], index: 2, kind: input, shape index: {}]   ;;  %s740_s3 = inlined_call_operand.vmem [shape: f32[32,64], index: 3, kind: output, shape index: {}]  }
   0x1   :  { %v534_v0 = vld [vmem:[%s737_s1 + $0x78] sm:$0xff]   ;;  %v538_v4 = vld [vmem:[%s737_s1 + $0x70] sm:$0xff]   ;;  %v542_v8 = vld [vmem:[%s737_s1 + $0x68] sm:$0xff]  }
   0x2   :  { %v535_v1 = vld [vmem:[%s737_s1 + $0xf8] sm:$0xff]   ;;  %478 = vmatprep.subr.bf16.mxu0 %v534_v0  ;;  %v539_v5 = vld [vmem:[%s737_s1 + $0xf0] sm:$0xff]   ;;  %v543_v9 = vld [vmem:[%s737_s1 + $0xe8] sm:$0xff]  }
   0x3   :  { %v536_v2 = vld [vmem:[%s737_s1 + $0x38] sm:$0xff]   ;;  %506 = vmatprep.subr.bf16.mxu1 %v535_v1  ;;  %v540_v6 = vld [vmem:[%s737_s1 + $0x30] sm:$0xff]   ;;  %v544_v10 = vld [vmem:[%s737_s1 + $0x28] sm:$0xff]  }
   0x4   :  { %v537_v3 = vld [vmem:[%s737_s1 + $0xb8] sm:$0xff]   ;;  %479 = vmatpush3.bf16.msra.mxu0 %v536_v2  ;;  %v541_v7 = vld [vmem:[%s737_s1 + $0xb0] sm:$0xff]   ;;  %v545_v11 = vld [vmem:[%s737_s1 + $0xa8] sm:$0xff]  }
   0x5   :  { %507 = vmatpush3.bf16.msra.mxu1 %v537_v3  ;;  %480 = vmatprep.subr.bf16.mxu0 %v538_v4  ;;  %v546_v12 = vld [vmem:[%s737_s1 + $0x60] sm:$0xff]   ;;  %v550_v16 = vld [vmem:[%s737_s1 + $0x58] sm:$0xff]   ;;  %v554_v20 = vld [vmem:[%s737_s1 + $0x50] sm:$0xff]  }
   0x6   :  { %508 = vmatprep.subr.bf16.mxu1 %v539_v5  ;;  %v547_v13 = vld [vmem:[%s737_s1 + $0xe0] sm:$0xff]   ;;  %v551_v17 = vld [vmem:[%s737_s1 + $0xd8] sm:$0xff]   ;;  %v555_v21 = vld [vmem:[%s737_s1 + $0xd0] sm:$0xff]  }
   0x7   :  { %v548_v14 = vld [vmem:[%s737_s1 + $0x20] sm:$0xff]   ;;  %v552_v18 = vld [vmem:[%s737_s1 + $0x18] sm:$0xff]   ;;  %v556_v22 = vld [vmem:[%s737_s1 + $0x10] sm:$0xff]  }
   0x8   :  { %481 = vmatpush3.bf16.msra.mxu0 %v540_v6  ;;  %v549_v15 = vld [vmem:[%s737_s1 + $0xa0] sm:$0xff]   ;;  %v553_v19 = vld [vmem:[%s737_s1 + $0x98] sm:$0xff]   ;;  %v557_v23 = vld [vmem:[%s737_s1 + $0x90] sm:$0xff]  }
   0x9   :  { %509 = vmatpush3.bf16.msra.mxu1 %v541_v7  ;;  %482 = vmatprep.subr.bf16.mxu0 %v542_v8  ;;  %v558_v24 = vld [vmem:[%s737_s1 + $0x48] sm:$0xff]   ;;  %v562_v28 = vld [vmem:[%s737_s1 + $0x40] sm:$0xff]  }
   0xa   :  { %510 = vmatprep.subr.bf16.mxu1 %v543_v9  ;;  %v559_v25 = vld [vmem:[%s737_s1 + $0xc8] sm:$0xff]   ;;  %v563_v29 = vld [vmem:[%s737_s1 + $0xc0] sm:$0xff]  }
   0xb   :  { %v560_v26 = vld [vmem:[%s737_s1 + $0x8] sm:$0xff]   ;;  %v564_v30 = vld [vmem:[%s737_s1] sm:$0xff]  }
   0xc   :  { %483 = vmatpush3.bf16.msra.mxu0 %v544_v10  ;;  %v561_v27 = vld [vmem:[%s737_s1 + $0x88] sm:$0xff]   ;;  %v565_v31 = vld [vmem:[%s737_s1 + $0x80] sm:$0xff]  }
   0xd   :  { %511 = vmatpush3.bf16.msra.mxu1 %v545_v11  ;;  %484 = vmatprep.subr.bf16.mxu0 %v546_v12  ;;  %v566_v32 = vld [vmem:[%s738_s0] ss:$16 sps:$4 sm:$0xff]   ;;  %v568_v33 = vld [vmem:[%s738_s0 + $0x4] ss:$16 sps:$4 sm:$0xff]   ;;  %v569_v34 = vld [vmem:[%s738_s0 + $0x8] ss:$16 sps:$4 sm:$0xff]  }
   0xe   :  { %512 = vmatprep.subr.bf16.mxu1 %v547_v13  ;;  %v571_v35 = vld [vmem:[%s738_s0 + $0xc] ss:$16 sps:$4 sm:$0xff]   ;;  %358 = vmatprep.mubr.bf16.mxu0 %v568_v33  ;;  %v572_v36 = vld [vmem:[%s738_s0 + $0x24] ss:$16 sps:$4 sm:$0xff]   ;;  %v576_v38 = vld [vmem:[%s738_s0 + $0x20] ss:$16 sps:$4 sm:$0xff]  }
   0xf   :  { %407 = vmatprep.mubr.bf16.mxu1 %v571_v35  ;;  %v574_v37 = vld [vmem:[%s738_s0 + $0x2c] ss:$16 sps:$4 sm:$0xff]   ;;  %v577_v39 = vld [vmem:[%s738_s0 + $0x28] ss:$16 sps:$4 sm:$0xff]   ;;  %v437_v42 = vld [vmem:[%s739_s2] ss:$0 sm:$0xff] }
  0x10   :  { %485 = vmatpush3.bf16.msra.mxu0 %v548_v14 }
  0x11   :  { %513 = vmatpush3.bf16.msra.mxu1 %v549_v15  ;;  %486 = vmatprep.subr.bf16.mxu0 %v550_v16 }
  0x12   :  { %514 = vmatprep.subr.bf16.mxu1 %v551_v17 }
  0x14   :  { %487 = vmatpush3.bf16.msra.mxu0 %v552_v18 }
  0x15   :  { %515 = vmatpush3.bf16.msra.mxu1 %v553_v19  ;;  %488 = vmatprep.subr.bf16.mxu0 %v554_v20 }
  0x16   :  { %516 = vmatprep.subr.bf16.mxu1 %v555_v21 }
  0x18   :  { %489 = vmatpush3.bf16.msra.mxu0 %v556_v22 }
  0x19   :  { %517 = vmatpush3.bf16.msra.mxu1 %v557_v23  ;;  %490 = vmatprep.subr.bf16.mxu0 %v558_v24 }
  0x1a   :  { %518 = vmatprep.subr.bf16.mxu1 %v559_v25 }
  0x1c   :  { %491 = vmatpush3.bf16.msra.mxu0 %v560_v26 }
  0x1d   :  { %519 = vmatpush3.bf16.msra.mxu1 %v561_v27  ;;  %492 = vmatprep.subr.bf16.mxu0 %v562_v28 }
  0x1e   :  { %520 = vmatprep.subr.bf16.mxu1 %v563_v29 }
  0x20   :  { %493 = vmatpush3.bf16.msra.mxu0 %v564_v30 }
  0x21   :  { %521 = vmatpush3.bf16.msra.mxu1 %v565_v31 }
  0x23   :  { %359 = vmatmul.mubr.bf16.vlgmr.msra.gmra.mxu0 %v566_v32 }
  0x24   :  { %408 = vmatmul.mubr.bf16.vlgmr.msra.gmra.mxu1 %v569_v34  ;;  %366 = vmatprep.mubr.bf16.mxu0 %v572_v36 }
  0x25   :  { %415 = vmatprep.mubr.bf16.mxu1 %v574_v37 }
  0x2b   :  { %367 = vmatmul.mubr.bf16.gmra.mxu0 %v576_v38 }
  0x2c   :  { %416 = vmatmul.mubr.bf16.gmra.mxu1 %v577_v39 }
  0xe3   :  { %v494_v40 = vpop.f32.mrf.mxu0 }
  0xe4   :  { %v522_v41 = vpop.f32.mrf.mxu1 }
  0xe5   :  { %v495_v43 = vpop.f32.mrf.mxu0 }
  0xe6   :  { %v496_v44 = vadd.f32 %v495_v43, %v494_v40  ;;  %v523_v45 = vpop.f32.mrf.mxu1 }
  0xe7   :  { %v497_v46 = vpop.f32.mrf.mxu0  ;;  %v524_v48 = vadd.f32 %v523_v45, %v522_v41 }
  0xe8   :  { %v361_v47 = vadd.f32 %v496_v44, %v437_v42  ;;  %v525_v49 = vpop.f32.mrf.mxu1 }
  0xe9   :  { %v498_v50 = vpop.f32.mrf.mxu0 }
  0xea   :  { %v410_v51 = vadd.f32 %v524_v48, %v361_v47  ;;  %v499_v52 = vadd.f32 %v498_v50, %v497_v46  ;;  %v526_v53 = vpop.f32.mrf.mxu1 }
  0xeb   :  { %v500_v54 = vpop.f32.mrf.mxu0  ;;  %v527_v57 = vadd.f32 %v526_v53, %v525_v49 }
  0xec   :  { %v424_v55 = vmax.f32 %v410_v51, 0.0  ;;  %v364_v56 = vadd.f32 %v499_v52, %v437_v42  ;;  %v528_v58 = vpop.f32.mrf.mxu1 }
  0xed   :  { %v501_v59 = vpop.f32.mrf.mxu0 }
  0xee   :  { %429 = vst.msk [vmem:[%s740_s3] sm:$0xff] %vm428_vm0, %v424_v55  ;;  %v413_v60 = vadd.f32 %v527_v57, %v364_v56  ;;  %v502_v61 = vadd.f32 %v501_v59, %v500_v54  ;;  %v529_v62 = vpop.f32.mrf.mxu1 }
  0xef   :  { %v503_v63 = vpop.f32.mrf.mxu0  ;;  %v530_v2 = vadd.f32 %v529_v62, %v528_v58 }
  0xf0   :  { %v425_v0 = vmax.f32 %v413_v60, 0.0  ;;  %v369_v1 = vadd.f32 %v502_v61, %v437_v42  ;;  %v531_v3 = vpop.f32.mrf.mxu1 }
  0xf1   :  { %v504_v4 = vpop.f32.mrf.mxu0 }
  0xf2   :  { %430 = vst.msk [vmem:[%s740_s3 + $0x8] sm:$0xff] %vm428_vm0, %v425_v0  ;;  %v418_v5 = vadd.f32 %v530_v2, %v369_v1  ;;  %v505_v6 = vadd.f32 %v504_v4, %v503_v63  ;;  %v532_v7 = vpop.f32.mrf.mxu1 }
  0xf3   :  { %v533_v10 = vadd.f32 %v532_v7, %v531_v3 }
  0xf4   :  { %v426_v8 = vmax.f32 %v418_v5, 0.0  ;;  %v372_v9 = vadd.f32 %v505_v6, %v437_v42 }
  0xf6   :  { %431 = vst.msk [vmem:[%s740_s3 + $0x10] sm:$0xff] %vm428_vm0, %v426_v8  ;;  %v421_v11 = vadd.f32 %v533_v10, %v372_v9 }
  0xf8   :  { %v427_v12 = vmax.f32 %v421_v11, 0.0 }
  0xfa   :  { %432 = vst.msk [vmem:[%s740_s3 + $0x18] sm:$0xff] %vm428_vm0, %v427_v12 }

// kernel: mnih2015_forward.5
= control target key start
LH: loop header
LB: loop body
LE: loop exit
PB: predicated region body
PF: predicated region fallthrough
CT: control target
= control target key end

     0   :  { %v113_v30 = vlaneseq  ;;  %v2847_v33 = vmov 1966171168   ;;  %v2848_v36 = vmov 0.0   ;;  %vm2849_vm0 = vmmov 0   ;;  %s3715_s0 = inlined_call_operand.vmem [shape: bf16[4,2,576], index: 0, kind: input, shape index: {}]   ;;  %s3716_s1 = inlined_call_operand.vmem [shape: bf16[576,64], index: 1, kind: input, shape index: {}]   ;;  %s3717_s2 = inlined_call_operand.vmem [shape: f32[1,64], index: 2, kind: input, shape index: {}]   ;;  %s3718_s3 = inlined_call_operand.vmem [shape: bf16[4,64,512], index: 3, kind: input, shape index: {}]   ;;  %s3719_s4 = inlined_call_operand.vmem [shape: f32[1,512], index: 4, kind: input, shape index: {}]   ;;  %s3720_s5 = inlined_call_operand.vmem [shape: bf16[512,6], index: 5, kind: input, shape index: {}]   ;;  %s3721_s6 = inlined_call_operand.vmem [shape: f32[1,6], index: 6, kind: input, shape index: {}]   ;;  %s3722_s7 = inlined_call_operand.hbm [shape: f32[2,6], index: 7, kind: output, shape index: {}]  }
   0x1   :  { %v2895_v0 = vld [vmem:[%s3716_s1 + $0x78] sm:$0xff]   ;;  %v2918_v4 = vld [vmem:[%s3716_s1 + $0x70] sm:$0xff]   ;;  %v2942_v8 = vld [vmem:[%s3716_s1 + $0x68] sm:$0xff]   ;;  %v111_v34 = vunpack.c.l.s4 %v2847_v33  ;;  %vm368_vm1 = vcmask 523264  }
   0x2   :  { %v2900_v1 = vld [vmem:[%s3716_s1 + $0xf8] sm:$0xff]   ;;  %2332 = vmatprep.subr.bf16.mxu0 %v2895_v0  ;;  %v2924_v5 = vld [vmem:[%s3716_s1 + $0xf0] sm:$0xff]   ;;  %v2948_v9 = vld [vmem:[%s3716_s1 + $0xe8] sm:$0xff]   ;;  %v3084_v35 = vshrl.u32 %v113_v30, 7 }
   0x3   :  { %v2906_v2 = vld [vmem:[%s3716_s1 + $0x38] sm:$0xff]   ;;  %2354 = vmatprep.subr.bf16.mxu1 %v2900_v1  ;;  %v2930_v6 = vld [vmem:[%s3716_s1 + $0x30] sm:$0xff]   ;;  %v2954_v10 = vld [vmem:[%s3716_s1 + $0x28] sm:$0xff]   ;;  %v112_v37 = vunpack.c.0.s8 %v111_v34 }
   0x4   :  { %v2912_v3 = vld [vmem:[%s3716_s1 + $0xb8] sm:$0xff]   ;;  %2333 = vmatpush3.bf16.msra.mxu0 %v2906_v2  ;;  %v2936_v7 = vld [vmem:[%s3716_s1 + $0xb0] sm:$0xff]   ;;  %v2960_v11 = vld [vmem:[%s3716_s1 + $0xa8] sm:$0xff]  }
   0x5   :  { %2355 = vmatpush3.bf16.msra.mxu1 %v2912_v3  ;;  %2334 = vmatprep.subr.bf16.mxu0 %v2918_v4  ;;  %v2966_v12 = vld [vmem:[%s3716_s1 + $0x60] sm:$0xff]   ;;  %v2990_v16 = vld [vmem:[%s3716_s1 + $0x58] sm:$0xff]   ;;  %v3014_v20 = vld [vmem:[%s3716_s1 + $0x50] sm:$0xff]   ;;  %v3097_v40 = vsub.s32 %v112_v37, %v3084_v35 }
   0x6   :  { %2356 = vmatprep.subr.bf16.mxu1 %v2924_v5  ;;  %v2972_v13 = vld [vmem:[%s3716_s1 + $0xe0] sm:$0xff]   ;;  %v2996_v17 = vld [vmem:[%s3716_s1 + $0xd8] sm:$0xff]   ;;  %v3020_v21 = vld [vmem:[%s3716_s1 + $0xd0] sm:$0xff]  }
   0x7   :  { %v2978_v14 = vld [vmem:[%s3716_s1 + $0x20] sm:$0xff]   ;;  %v3002_v18 = vld [vmem:[%s3716_s1 + $0x18] sm:$0xff]   ;;  %v3026_v22 = vld [vmem:[%s3716_s1 + $0x10] sm:$0xff]  }
   0x8   :  { %2335 = vmatpush3.bf16.msra.mxu0 %v2930_v6  ;;  %v2984_v15 = vld [vmem:[%s3716_s1 + $0xa0] sm:$0xff]   ;;  %v3008_v19 = vld [vmem:[%s3716_s1 + $0x98] sm:$0xff]   ;;  %v3032_v23 = vld [vmem:[%s3716_s1 + $0x90] sm:$0xff]  }
   0x9   :  { %2357 = vmatpush3.bf16.msra.mxu1 %v2936_v7  ;;  %2336 = vmatprep.subr.bf16.mxu0 %v2942_v8  ;;  %v3038_v24 = vld [vmem:[%s3716_s1 + $0x48] sm:$0xff]   ;;  %v3062_v28 = vld [vmem:[%s3716_s1 + $0x40] sm:$0xff]   ;;  %v3106_v45 = vld [vmem:[%s3716_s1 + $0x118] sm:$0xff]  }
   0xa   :  { %2358 = vmatprep.subr.bf16.mxu1 %v2948_v9  ;;  %v3044_v25 = vld [vmem:[%s3716_s1 + $0xc8] sm:$0xff]   ;;  %v3068_v29 = vld [vmem:[%s3716_s1 + $0xc0] sm:$0xff]   ;;  %v3112_v50 = vld [vmem:[%s3716_s1 + $0x110] sm:$0xff]  }
   0xb   :  { %v3050_v26 = vld [vmem:[%s3716_s1 + $0x8] sm:$0xff]   ;;  %v3074_v31 = vld [vmem:[%s3716_s1] sm:$0xff]  }
   0xc   :  { %2337 = vmatpush3.bf16.msra.mxu0 %v2954_v10  ;;  %v3056_v27 = vld [vmem:[%s3716_s1 + $0x88] sm:$0xff]   ;;  %v3080_v32 = vld [vmem:[%s3716_s1 + $0x80] sm:$0xff]  }
   0xd   :  { %2359 = vmatpush3.bf16.msra.mxu1 %v2960_v11  ;;  %2338 = vmatprep.subr.bf16.mxu0 %v2966_v12  ;;  %v101_v38 = vld [vmem:[%s3715_s0] sm:$0x1f]  ;;  %v3094_v39 = vld [vmem:[%s3715_s0 + $0x5] sm:$0x1f] }
   0xe   :  { %2360 = vmatprep.subr.bf16.mxu1 %v2972_v13  ;;  %v116_v41 = vrot.slane %v101_v38, %v3097_v40  ;;  %v520_v42 = vrot.slane %v3094_v39, %v3097_v40  ;;  %v3121_v52 = vld [vmem:[%s3716_s1 + $0x108] sm:$0xff]   ;;  %v109_v53 = vcombine.high %v101_v38, %v101_v38  ;;  %v3132_v54 = vld [vmem:[%s3716_s1 + $0x100] sm:$0xff]  }
  0x10   :  { %2339 = vmatpush3.bf16.msra.mxu0 %v2978_v14  ;;  %v124_v43 = vcombine.high %v116_v41, %v116_v41  ;;  %v131_v44 = vrot.slane %v116_v41, %v3097_v40  ;;  %v528_v46 = vcombine.high %v520_v42, %v520_v42  ;;  %v123_v55 = vrot.slane %v109_v53, %v3097_v40 }
  0x11   :  { %2361 = vmatpush3.bf16.msra.mxu1 %v2984_v15  ;;  %2340 = vmatprep.subr.bf16.mxu0 %v2990_v16  ;;  %v535_v58 = vrot.slane %v520_v42, %v3097_v40 }
  0x12   :  { %2362 = vmatprep.subr.bf16.mxu1 %v2996_v17  ;;  %v145_v47 = vrot.slane %v124_v43, %v3097_v40  ;;  %v146_v48 = vcombine.high %v131_v44, %v131_v44  ;;  %v549_v51 = vrot.slane %v528_v46, %v3097_v40  ;;  %v138_v56 = vrot.slane %v123_v55, %v3097_v40 }
  0x14   :  { %2341 = vmatpush3.bf16.msra.mxu0 %v3002_v18  ;;  %404 = vmatprep.mubr.bf16.mxu0 %v145_v47  ;;  %v147_v49 = vcombine.high %v145_v47, %v145_v47  ;;  %v551_v57 = vcombine.high %v549_v51, %v549_v51 }
  0x15   :  { %2363 = vmatpush3.bf16.msra.mxu1 %v3008_v19  ;;  %2342 = vmatprep.subr.bf16.mxu0 %v3014_v20 }
  0x16   :  { %2364 = vmatprep.subr.bf16.mxu1 %v3020_v21  ;;  %444 = vmatprep.mubr.bf16.mxu1 %v147_v49 }
  0x18   :  { %2343 = vmatpush3.bf16.msra.mxu0 %v3026_v22 }
  0x19   :  { %2365 = vmatpush3.bf16.msra.mxu1 %v3032_v23  ;;  %2344 = vmatprep.subr.bf16.mxu0 %v3038_v24 }
  0x1a   :  { %2366 = vmatprep.subr.bf16.mxu1 %v3044_v25 }
  0x1c   :  { %2345 = vmatpush3.bf16.msra.mxu0 %v3050_v26 }
  0x1d   :  { %2367 = vmatpush3.bf16.msra.mxu1 %v3056_v27  ;;  %2346 = vmatprep.subr.bf16.mxu0 %v3062_v28 }
  0x1e   :  { %2368 = vmatprep.subr.bf16.mxu1 %v3068_v29 }
  0x20   :  { %2347 = vmatpush3.bf16.msra.mxu0 %v3074_v31 }
  0x21   :  { %2369 = vmatpush3.bf16.msra.mxu1 %v3080_v32  ;;  %2572 = vmatprep.subr.bf16.mxu0 %v2848_v36 }
  0x22   :  { %2381 = vmatprep.subr.bf16.mxu1 %v2895_v0 }
  0x23   :  { %405 = vmatmul.mubr.bf16.vlgmr.msra.gmra.mxu0 %v131_v44 }
  0x24   :  { %2573 = vmatpush3.bf16.msra.mxu0 %v3106_v45  ;;  %445 = vmatmul.mubr.bf16.vlgmr.msra.gmra.mxu1 %v146_v48 }
  0x25   :  { %2574 = vmatprep.subr.bf16.mxu0 %v2848_v36  ;;  %2382 = vmatpush3.bf16.msra.mxu1 %v2906_v2 }
  0x26   :  { %2580 = vmatprep.mubr.msk.bf16.mxu0 %vm2849_vm0, %v2848_v36  ;;  %2383 = vmatprep.subr.bf16.mxu1 %v2918_v4 }
  0x27   :  { %591 = vmatprep.mubr.bf16.mxu1 %v549_v51 }
  0x28   :  { %2575 = vmatpush3.bf16.msra.mxu0 %v3112_v50 }
  0x29   :  { %2576 = vmatprep.subr.bf16.mxu0 %v2848_v36  ;;  %2384 = vmatpush3.bf16.msra.mxu1 %v2930_v6 }
  0x2a   :  { %2385 = vmatprep.subr.bf16.mxu1 %v2942_v8 }
  0x2c   :  { %2577 = vmatpush3.bf16.msra.mxu0 %v3121_v52 }
  0x2d   :  { %2578 = vmatprep.subr.bf16.mxu0 %v2848_v36  ;;  %2386 = vmatpush3.bf16.msra.mxu1 %v2954_v10 }
  0x2e   :  { %2387 = vmatprep.subr.bf16.mxu1 %v2966_v12 }
  0x30   :  { %2579 = vmatpush3.bf16.msra.mxu0 %v3132_v54 }
  0x31   :  { %2403 = vmatprep.subr.bf16.mxu0 %v2900_v1  ;;  %2388 = vmatpush3.bf16.msra.mxu1 %v2978_v14 }
  0x32   :  { %2389 = vmatprep.subr.bf16.mxu1 %v2990_v16 }
  0x33   :  { %2581 = vmatmul.mubr.msk.bf16.vlgmr.msra.gmra.mxu0 %vm368_vm1, %v138_v56 }
  0x34   :  { %2404 = vmatpush3.bf16.msra.mxu0 %v2912_v3  ;;  %631 = vmatprep.mubr.bf16.mxu0 %v551_v57 }
  0x35   :  { %2405 = vmatprep.subr.bf16.mxu0 %v2924_v5  ;;  %2390 = vmatpush3.bf16.msra.mxu1 %v3002_v18 }
  0x36   :  { %2391 = vmatprep.subr.bf16.mxu1 %v3014_v20 }
  0x38   :  { %2406 = vmatpush3.bf16.msra.mxu0 %v2936_v7 }
  0x39   :  { %2407 = vmatprep.subr.bf16.mxu0 %v2948_v9  ;;  %2392 = vmatpush3.bf16.msra.mxu1 %v3026_v22 }
  0x3a   :  { %2393 = vmatprep.subr.bf16.mxu1 %v3038_v24 }
  0x3c   :  { %2408 = vmatpush3.bf16.msra.mxu0 %v2960_v11 }
  0x3d   :  { %2409 = vmatprep.subr.bf16.mxu0 %v2972_v13  ;;  %2394 = vmatpush3.bf16.msra.mxu1 %v3050_v26 }
  0x3e   :  { %2395 = vmatprep.subr.bf16.mxu1 %v3062_v28 }
  0x40   :  { %2410 = vmatpush3.bf16.msra.mxu0 %v2984_v15 }
  0x41   :  { %2411 = vmatprep.subr.bf16.mxu0 %v2996_v17  ;;  %2396 = vmatpush3.bf16.msra.mxu1 %v3074_v31 }
  0x42   :  { %2584 = vmatprep.subr.bf16.mxu1 %v2848_v36 }
  0x44   :  { %2412 = vmatpush3.bf16.msra.mxu0 %v3008_v19 }
  0x45   :  { %12 = vsyncpa [#allocation3], 0  ;;  %592 = vmatmul.mubr.bf16.vlgmr.msra.gmra.mxu1 %v535_v58  ;;  %2413 = vmatprep.subr.bf16.mxu0 %v3020_v21  ;;  %v513_v59 = vcombine.high %v3094_v39, %v3094_v39  ;;  %v550_v61 = vcombine.high %v535_v58, %v535_v58  ;;  %v2663_v63 = vld [vmem:[%s3718_s3 + $0xe0] ss:$16 sps:$4 sm:$0xff]   ;;  %v2665_v30 = vld [vmem:[%s3718_s3 + $0xe4] ss:$16 sps:$4 sm:$0xff]  }
  0x46   :  { %2585 = vmatpush3.bf16.msra.mxu1 %v3106_v45  ;;  %2592 = vmatprep.mubr.msk.bf16.mxu1 %vm2849_vm0, %v2848_v36  ;;  %v2666_v33 = vld [vmem:[%s3718_s3 + $0xe8] ss:$16 sps:$4 sm:$0xff]   ;;  %v2668_v34 = vld [vmem:[%s3718_s3 + $0xec] ss:$16 sps:$4 sm:$0xff]   ;;  %v2671_v37 = vld [vmem:[%s3718_s3 + $0xc4] ss:$16 sps:$4 sm:$0xff]  }
  0x47   :  { %2586 = vmatprep.subr.bf16.mxu1 %v2848_v36  ;;  %v527_v60 = vrot.slane %v513_v59, %v3097_v40  ;;  %v2674_v38 = vld [vmem:[%s3718_s3 + $0xcc] ss:$16 sps:$4 sm:$0xff]   ;;  %v2669_v39 = vld [vmem:[%s3718_s3 + $0xc0] ss:$16 sps:$4 sm:$0xff]   ;;  %v2672_v41 = vld [vmem:[%s3718_s3 + $0xc8] ss:$16 sps:$4 sm:$0xff]  }
  0x48   :  { %2414 = vmatpush3.bf16.msra.mxu0 %v3032_v23  ;;  %v2677_v42 = vld [vmem:[%s3718_s3 + $0xa4] ss:$16 sps:$4 sm:$0xff]   ;;  %v2680_v43 = vld [vmem:[%s3718_s3 + $0xac] ss:$16 sps:$4 sm:$0xff]   ;;  %v2675_v44 = vld [vmem:[%s3718_s3 + $0xa0] ss:$16 sps:$4 sm:$0xff]  }
  0x49   :  { %2415 = vmatprep.subr.bf16.mxu0 %v3044_v25  ;;  %v542_v62 = vrot.slane %v527_v60, %v3097_v40  ;;  %v2678_v46 = vld [vmem:[%s3718_s3 + $0xa8] ss:$16 sps:$4 sm:$0xff]   ;;  %v2683_v47 = vld [vmem:[%s3718_s3 + $0x84] ss:$16 sps:$4 sm:$0xff]   ;;  %v2686_v48 = vld [vmem:[%s3718_s3 + $0x8c] ss:$16 sps:$4 sm:$0xff]  }
  0x4a   :  { %2587 = vmatpush3.bf16.msra.mxu1 %v3112_v50  ;;  %v2681_v49 = vld [vmem:[%s3718_s3 + $0x80] ss:$16 sps:$4 sm:$0xff]   ;;  %v2684_v51 = vld [vmem:[%s3718_s3 + $0x88] ss:$16 sps:$4 sm:$0xff]   ;;  %v2689_v53 = vld [vmem:[%s3718_s3 + $0x64] ss:$16 sps:$4 sm:$0xff]  }
  0x4b   :  { %2588 = vmatprep.subr.bf16.mxu1 %v2848_v36  ;;  %v2850_v55 = vmov 0   ;;  %v2692_v56 = vld [vmem:[%s3718_s3 + $0x6c] ss:$16 sps:$4 sm:$0xff]   ;;  %v3243_v59 = vld [vmem:[%s3717_s2] ss:$0 sm:$0xff]  ;;  %s2851_s19 = smov [#allocation2]  }
  0x4c   :  { %2416 = vmatpush3.bf16.msra.mxu0 %v3056_v27  ;;  %s2127_s20 = sshll.u32 %s2851_s19, 4  ;;  %vm2119_vm2 = vcmask 41984   ;;  %s2128_s20 = int_to_ptr.vmem [resolvable:$true] %s2127_s20 }
  0x4d   :  { %2417 = vmatprep.subr.bf16.mxu0 %v3068_v29  ;;  %s2825_s21 = scalar_lea.vmem %s2128_s20, 32  ;;  %p2830_p1 = scmp.lt.s32.totalorder %s2128_s20, %s2128_s20 }
  0x4e   :  { %2589 = vmatpush3.bf16.msra.mxu1 %v3121_v52  ;;  %p2826_p0 = scmp.ne.s32.totalorder %s2128_s20, %s2825_s21  ;;  %p2831_p2 = scmp.lt.s32.totalorder %s2825_s21, %s2825_s21 }
  0x4f   :  { %2590 = vmatprep.subr.bf16.mxu1 %v2848_v36 }
  0x50   :  { %2418 = vmatpush3.bf16.msra.mxu0 %v3080_v32  ;;  %p2832_p3 = por %p2831_p2, %p2830_p1 }
  0x51   :  { %789 = vmatprep.subr.bf16.mxu0 %v2665_v30 }
  0x52   :  { %2591 = vmatpush3.bf16.msra.mxu1 %v3132_v54  ;;  %p2833_p4 = pnand %p2832_p3, %p2826_p0 }
  0x53   :  { %632 = vmatmul.mubr.bf16.vlgmr.msra.gmra.mxu0 %v550_v61  ;;  %830 = vmatprep.subr.bf16.mxu1 %v2668_v34 }
  0x54   :  { %790 = vmatpush1.bf16.msra.mxu0 %v2663_v63  ;;  %813 = vmatprep.mubr.bf16.mxu0 %v2850_v55 }
  0x55   :  { %2593 = vmatmul.mubr.msk.bf16.vlgmr.msra.gmra.mxu1 %vm368_vm1, %v542_v62  ;;  %791 = vmatprep.subr.bf16.mxu0 %v2671_v37 }
  0x56   :  { %831 = vmatpush1.bf16.msra.mxu1 %v2666_v33  ;;  %854 = vmatprep.mubr.bf16.mxu1 %v2850_v55 }
  0x57   :  { %832 = vmatprep.subr.bf16.mxu1 %v2674_v38 }
  0x58   :  { %792 = vmatpush1.bf16.msra.mxu0 %v2669_v39 }
  0x59   :  { %793 = vmatprep.subr.bf16.mxu0 %v2677_v42 }
  0x5a   :  { %833 = vmatpush1.bf16.msra.mxu1 %v2672_v41 }
  0x5b   :  { %834 = vmatprep.subr.bf16.mxu1 %v2680_v43 }
  0x5c   :  { %794 = vmatpush1.bf16.msra.mxu0 %v2675_v44 }
  0x5d   :  { %795 = vmatprep.subr.bf16.mxu0 %v2683_v47 }
  0x5e   :  { %835 = vmatpush1.bf16.msra.mxu1 %v2678_v46 }
  0x5f   :  { %836 = vmatprep.subr.bf16.mxu1 %v2686_v48 }
  0x60   :  { %796 = vmatpush1.bf16.msra.mxu0 %v2681_v49 }
  0x61   :  { %954 = vmatprep.subr.bf16.mxu0 %v2689_v53 }
  0x62   :  { %837 = vmatpush1.bf16.msra.mxu1 %v2684_v51 }
  0x63   :  { %995 = vmatprep.subr.bf16.mxu1 %v2692_v56 }
  0xe3   :  { %v2348_v57 = vpop.f32.mrf.mxu0 }
  0xe4   :  { %v2370_v58 = vpop.f32.mrf.mxu1 }
  0xe5   :  { %v2349_v60 = vpop.f32.mrf.mxu0 }
  0xe6   :  { %v2350_v61 = vadd.f32 %v2349_v60, %v2348_v57  ;;  %v2371_v62 = vpop.f32.mrf.mxu1 }
  0xe7   :  { %v2351_v63 = vpop.f32.mrf.mxu0  ;;  %v2372_v33 = vadd.f32 %v2371_v62, %v2370_v58 }
  0xe8   :  { %v407_v30 = vadd.f32 %v2350_v61, %v3243_v59  ;;  %v2373_v34 = vpop.f32.mrf.mxu1 }
  0xe9   :  { %v2352_v37 = vpop.f32.mrf.mxu0 }
  0xea   :  { %v447_v38 = vadd.f32 %v2372_v33, %v407_v30  ;;  %v2374_v39 = vpop.f32.mrf.mxu1 }
  0xf3   :  { %v486_v41 = vpop.f32.mrf.mxu0 }
  0xf5   :  { %v2582_v42 = vpop.f32.mrf.mxu0 }
  0xf6   :  { %v2687_v42 = vld [vmem:[%s3718_s3 + $0x60] ss:$16 sps:$4 sm:$0xff]  }
  0xf7   :  { %v489_v43 = vpop.f32.mrf.mxu0 }
  0xf8   :  { %v2690_v43 = vld [vmem:[%s3718_s3 + $0x68] ss:$16 sps:$4 sm:$0xff]  }
  0xf9   :  { %v2583_v44 = vpop.f32.mrf.mxu0 }
 0x105   :  { %v2397_v46 = vpop.f32.mrf.mxu1 }
 0x107   :  { %v2398_v47 = vpop.f32.mrf.mxu1 }
 0x108   :  { %v2399_v51 = vadd.f32 %v2398_v47, %v2397_v46  ;;  %v2695_v46 = vld [vmem:[%s3718_s3 + $0x44] ss:$16 sps:$4 sm:$0xff]   ;;  %v2698_v47 = vld [vmem:[%s3718_s3 + $0x4c] ss:$16 sps:$4 sm:$0xff]  }
 0x109   :  { %v2400_v48 = vpop.f32.mrf.mxu1 }
 0x10a   :  { %v594_v60 = vadd.f32 %v2399_v51, %v3243_v59  ;;  %v3264_v48 = vld [vmem:[%s3715_s0 + $0xa] sm:$0x1f] }
 0x10b   :  { %v2401_v49 = vpop.f32.mrf.mxu1  ;;  %v2696_v51 = vld [vmem:[%s3718_s3 + $0x48] ss:$16 sps:$4 sm:$0xff]  }
 0x10c   :  { %v2693_v49 = vld [vmem:[%s3718_s3 + $0x40] ss:$16 sps:$4 sm:$0xff]  }
 0x113   :  { %v2419_v53 = vpop.f32.mrf.mxu0 }
 0x115   :  { %v673_v56 = vpop.f32.mrf.mxu1  ;;  %v2420_v57 = vpop.f32.mrf.mxu0 }
 0x116   :  { %v2421_v61 = vadd.f32 %v2420_v57, %v2419_v53  ;;  %v2701_v53 = vld [vmem:[%s3718_s3 + $0x24] ss:$16 sps:$4 sm:$0xff]   ;;  %v1038_v57 = vrot.slane %v3264_v48, %v3097_v40 }
 0x117   :  { %v2594_v58 = vpop.f32.mrf.mxu1  ;;  %v2422_v62 = vpop.f32.mrf.mxu0 }
 0x118   :  { %v634_v63 = vadd.f32 %v2421_v61, %v594_v60  ;;  %v2699_v60 = vld [vmem:[%s3718_s3 + $0x20] ss:$16 sps:$4 sm:$0xff]   ;;  %v2702_v61 = vld [vmem:[%s3718_s3 + $0x28] ss:$16 sps:$4 sm:$0xff]   ;;  %v487_v58 = vadd.f32 %v486_v41, %v447_v38  ;;  %v2707_v62 = vld [vmem:[%s3718_s3 + $0x4] ss:$16 sps:$4 sm:$0xff]  }
 0x119   :  { %v676_v30 = vpop.f32.mrf.mxu1  ;;  %v2423_v33 = vpop.f32.mrf.mxu0  ;;  %v2708_v38 = vld [vmem:[%s3718_s3 + $0x8] ss:$16 sps:$4 sm:$0xff]  }
 0x11a   :  { %v674_v34 = vadd.f32 %v673_v56, %v634_v63  ;;  %v2704_v56 = vld [vmem:[%s3718_s3 + $0x2c] ss:$16 sps:$4 sm:$0xff]   ;;  %v1046_v30 = vcombine.high %v1038_v57, %v1038_v57  ;;  %v2705_v33 = vld [vmem:[%s3718_s3] ss:$16 sps:$4 sm:$0xff]   ;;  %v492_v41 = vmax.f32 %v487_v58, 0.0 }
 0x11b   :  { %v2595_v37 = vpop.f32.mrf.mxu1  ;;  %v2710_v63 = vld [vmem:[%s3718_s3 + $0xc] ss:$16 sps:$4 sm:$0xff]  }
 0x11c   :  { %v679_v39 = vmax.f32 %v674_v34, 0.0  ;;  %v1067_v34 = vrot.slane %v1046_v30, %v3097_v40  ;;  %v493_v37 = vpack.c.bf16 %v492_v41, %v492_v41 }
 0x11e   :  { %v680_v44 = vpack.c.bf16 %v679_v39, %v679_v39  ;;  %v1069_v39 = vcombine.high %v1067_v34, %v1067_v34 }
 0x120   :  { %2207 = vmatmul.mubr.msk.bf16.vlgmr.msra.gmra.mxu0 %vm368_vm1, %v680_v44  ;;  %2208 = vmatmul.mubr.msk.bf16.vlgmr.msra.gmra.mxu1 %vm368_vm1, %v680_v44 }
 0x121   :  { %955 = vmatpush1.bf16.msra.mxu0 %v2687_v42  ;;  %996 = vmatpush1.bf16.msra.mxu1 %v2690_v43 }
 0x122   :  { %956 = vmatprep.subr.bf16.mxu0 %v2695_v46  ;;  %997 = vmatprep.subr.bf16.mxu1 %v2698_v47 }
 0x123   :  { %978 = vmatprep.mubr.bf16.mxu0 %v2850_v55  ;;  %1019 = vmatprep.mubr.bf16.mxu1 %v2850_v55 }
 0x125   :  { %957 = vmatpush1.bf16.msra.mxu0 %v2693_v49  ;;  %998 = vmatpush1.bf16.msra.mxu1 %v2696_v51 }
 0x126   :  { %958 = vmatprep.subr.bf16.mxu0 %v2701_v53  ;;  %999 = vmatprep.subr.bf16.mxu1 %v2704_v56 }
 0x129   :  { %959 = vmatpush1.bf16.msra.mxu0 %v2699_v60  ;;  %1000 = vmatpush1.bf16.msra.mxu1 %v2702_v61 }
 0x12a   :  { %960 = vmatprep.subr.bf16.mxu0 %v2707_v62  ;;  %1001 = vmatprep.subr.bf16.mxu1 %v2710_v63 }
 0x12d   :  { %961 = vmatpush1.bf16.msra.mxu0 %v2705_v33  ;;  %1002 = vmatpush1.bf16.msra.mxu1 %v2708_v38 }
 0x12e   :  { %2430 = vmatprep.subr.bf16.mxu0 %v2895_v0  ;;  %2452 = vmatprep.subr.bf16.mxu1 %v2900_v1  ;;  %v1053_v0 = vrot.slane %v1038_v57, %v3097_v40 }
 0x130   :  { %2225 = vmatmul.mubr.msk.bf16.vlgmr.msra.gmra.mxu0 %vm368_vm1, %v493_v37  ;;  %2226 = vmatmul.mubr.msk.bf16.vlgmr.msra.gmra.mxu1 %vm368_vm1, %v493_v37  ;;  %v1068_v1 = vcombine.high %v1053_v0, %v1053_v0 }
 0x131   :  { %2431 = vmatpush3.bf16.msra.mxu0 %v2906_v2  ;;  %2453 = vmatpush3.bf16.msra.mxu1 %v2912_v3  ;;  %v1031_v2 = vcombine.high %v3264_v48, %v3264_v48 }
 0x132   :  { %2432 = vmatprep.subr.bf16.mxu0 %v2918_v4  ;;  %2454 = vmatprep.subr.bf16.mxu1 %v2924_v5  ;;  %v2714_v5 = vld [vmem:[%s3718_s3 + $0x164] ss:$16 sps:$4 sm:$0xff]  }
 0x133   :  { %1109 = vmatprep.mubr.bf16.mxu0 %v1067_v34  ;;  %1149 = vmatprep.mubr.bf16.mxu1 %v1069_v39  ;;  %v1045_v3 = vrot.slane %v1031_v2, %v3097_v40  ;;  %v3418_v34 = vld [vmem:[%s3715_s0 + $0xf] sm:$0x1f] }
 0x134   :  { %v3422_v37 = vrot.slane %v3418_v34, %v3097_v40 }
 0x135   :  { %2433 = vmatpush3.bf16.msra.mxu0 %v2930_v6  ;;  %2455 = vmatpush3.bf16.msra.mxu1 %v2936_v7  ;;  %v1060_v4 = vrot.slane %v1045_v3, %v3097_v40  ;;  %v2712_v6 = vld [vmem:[%s3718_s3 + $0x160] ss:$16 sps:$4 sm:$0xff]   ;;  %v2715_v7 = vld [vmem:[%s3718_s3 + $0x168] ss:$16 sps:$4 sm:$0xff]  }
 0x136   :  { %2434 = vmatprep.subr.bf16.mxu0 %v2942_v8  ;;  %2456 = vmatprep.subr.bf16.mxu1 %v2948_v9  ;;  %v2717_v8 = vld [vmem:[%s3718_s3 + $0x16c] ss:$16 sps:$4 sm:$0xff]   ;;  %v2720_v9 = vld [vmem:[%s3718_s3 + $0x144] ss:$16 sps:$4 sm:$0xff]  }
 0x139   :  { %2435 = vmatpush3.bf16.msra.mxu0 %v2954_v10  ;;  %2457 = vmatpush3.bf16.msra.mxu1 %v2960_v11  ;;  %v2718_v10 = vld [vmem:[%s3718_s3 + $0x140] ss:$16 sps:$4 sm:$0xff]   ;;  %v2723_v11 = vld [vmem:[%s3718_s3 + $0x14c] ss:$16 sps:$4 sm:$0xff]  }
 0x13a   :  { %2436 = vmatprep.subr.bf16.mxu0 %v2966_v12  ;;  %2458 = vmatprep.subr.bf16.mxu1 %v2972_v13  ;;  %v2721_v12 = vld [vmem:[%s3718_s3 + $0x148] ss:$16 sps:$4 sm:$0xff]   ;;  %v2726_v13 = vld [vmem:[%s3718_s3 + $0x124] ss:$16 sps:$4 sm:$0xff]  }
 0x13d   :  { %2437 = vmatpush3.bf16.msra.mxu0 %v2978_v14  ;;  %2459 = vmatpush3.bf16.msra.mxu1 %v2984_v15  ;;  %v2729_v14 = vld [vmem:[%s3718_s3 + $0x12c] ss:$16 sps:$4 sm:$0xff]   ;;  %v2724_v15 = vld [vmem:[%s3718_s3 + $0x120] ss:$16 sps:$4 sm:$0xff]  }
 0x13e   :  { %2438 = vmatprep.subr.bf16.mxu0 %v2990_v16  ;;  %2460 = vmatprep.subr.bf16.mxu1 %v2996_v17  ;;  %v2727_v16 = vld [vmem:[%s3718_s3 + $0x128] ss:$16 sps:$4 sm:$0xff]   ;;  %v2732_v17 = vld [vmem:[%s3718_s3 + $0x104] ss:$16 sps:$4 sm:$0xff]  }
 0x141   :  { %2439 = vmatpush3.bf16.msra.mxu0 %v3002_v18  ;;  %2461 = vmatpush3.bf16.msra.mxu1 %v3008_v19  ;;  %v2730_v18 = vld [vmem:[%s3718_s3 + $0x100] ss:$16 sps:$4 sm:$0xff]   ;;  %v2735_v19 = vld [vmem:[%s3718_s3 + $0x10c] ss:$16 sps:$4 sm:$0xff]  }
 0x142   :  { %2440 = vmatprep.subr.bf16.mxu0 %v3014_v20  ;;  %2462 = vmatprep.subr.bf16.mxu1 %v3020_v21  ;;  %v2733_v20 = vld [vmem:[%s3718_s3 + $0x108] ss:$16 sps:$4 sm:$0xff]  }
 0x143   :  { %v2793_v21 = vld [vmem:[%s3716_s1 + $0x78] sm:$0xff]  }
 0x145   :  { %2441 = vmatpush3.bf16.msra.mxu0 %v3026_v22  ;;  %2463 = vmatpush3.bf16.msra.mxu1 %v3032_v23  ;;  %v2794_v22 = vld [vmem:[%s3716_s1 + $0xf8] sm:$0xff]  }
 0x146   :  { %2442 = vmatprep.subr.bf16.mxu0 %v3038_v24  ;;  %2464 = vmatprep.subr.bf16.mxu1 %v3044_v25 }
 0x149   :  { %2443 = vmatpush3.bf16.msra.mxu0 %v3050_v26  ;;  %2465 = vmatpush3.bf16.msra.mxu1 %v3056_v27 }
 0x14a   :  { %2444 = vmatprep.subr.bf16.mxu0 %v3062_v28  ;;  %2466 = vmatprep.subr.bf16.mxu1 %v3068_v29 }
 0x14d   :  { %2445 = vmatpush3.bf16.msra.mxu0 %v3074_v31  ;;  %2467 = vmatpush3.bf16.msra.mxu1 %v3080_v32 }
 0x14e   :  { %2596 = vmatprep.subr.bf16.mxu0 %v2848_v36  ;;  %1307 = vmatprep.subr.bf16.mxu1 %v2714_v5 }
 0x150   :  { %1110 = vmatmul.mubr.bf16.vlgmr.msra.gmra.mxu0 %v1053_v0  ;;  %1150 = vmatmul.mubr.bf16.vlgmr.msra.gmra.mxu1 %v1068_v1  ;;  %v1403_v1 = vcombine.high %v3422_v37, %v3422_v37 }
 0x151   :  { %2597 = vmatpush3.bf16.msra.mxu0 %v3106_v45  ;;  %2604 = vmatprep.mubr.msk.bf16.mxu0 %vm2849_vm0, %v2848_v36 }
 0x152   :  { %2598 = vmatprep.subr.bf16.mxu0 %v2848_v36  ;;  %1331 = vmatprep.mubr.bf16.mxu1 %v2850_v55 }
 0x153   :  { %1308 = vmatpush1.bf16.msra.mxu1 %v2712_v6  ;;  %v1424_v6 = vrot.slane %v1403_v1, %v3097_v40  ;;  %v2757_v1 = vld [vmem:[%s3718_s3 + $0x184] ss:$16 sps:$4 sm:$0xff]  }
 0x154   :  { %1309 = vmatprep.subr.bf16.mxu1 %v2720_v9 }
 0x155   :  { %2599 = vmatpush3.bf16.msra.mxu0 %v3112_v50 }
 0x156   :  { %2600 = vmatprep.subr.bf16.mxu0 %v2848_v36 }
 0x157   :  { %1310 = vmatpush1.bf16.msra.mxu1 %v2718_v10 }
 0x158   :  { %1311 = vmatprep.subr.bf16.mxu1 %v2726_v13  ;;  %v2796_v13 = vld [vmem:[%s3716_s1 + $0xb8] sm:$0xff]  }
 0x159   :  { %2601 = vmatpush3.bf16.msra.mxu0 %v3121_v52 }
 0x15a   :  { %2602 = vmatprep.subr.bf16.mxu0 %v2848_v36 }
 0x15b   :  { %1312 = vmatpush1.bf16.msra.mxu1 %v2724_v15  ;;  %v2798_v15 = vld [vmem:[%s3716_s1 + $0xf0] sm:$0xff]  }
 0x15c   :  { %1313 = vmatprep.subr.bf16.mxu1 %v2732_v17  ;;  %v2800_v17 = vld [vmem:[%s3716_s1 + $0xb0] sm:$0xff]  }
 0x15d   :  { %2603 = vmatpush3.bf16.msra.mxu0 %v3132_v54 }
 0x15e   :  { %1348 = vmatprep.subr.bf16.mxu0 %v2717_v8 }
 0x15f   :  { %1314 = vmatpush1.bf16.msra.mxu1 %v2730_v18  ;;  %v2801_v18 = vld [vmem:[%s3716_s1 + $0x68] sm:$0xff]  }
 0x160   :  { %2605 = vmatmul.mubr.msk.bf16.vlgmr.msra.gmra.mxu0 %vm368_vm1, %v1060_v4  ;;  %2479 = vmatprep.subr.bf16.mxu1 %v2793_v21  ;;  %v2804_v21 = vld [vmem:[%s3716_s1 + $0xa8] sm:$0xff]  }
 0x161   :  { %1372 = vmatprep.mubr.bf16.mxu0 %v2850_v55  ;;  %1349 = vmatpush1.bf16.msra.mxu0 %v2715_v7 }
 0x162   :  { %1350 = vmatprep.subr.bf16.mxu0 %v2723_v11  ;;  %v1426_v11 = vcombine.high %v1424_v6, %v1424_v6 }
 0x165   :  { %1351 = vmatpush1.bf16.msra.mxu0 %v2721_v12  ;;  %v2795_v12 = vld [vmem:[%s3716_s1 + $0x38] sm:$0xff]  }
 0x166   :  { %1352 = vmatprep.subr.bf16.mxu0 %v2729_v14  ;;  %v2797_v14 = vld [vmem:[%s3716_s1 + $0x70] sm:$0xff]  }
 0x169   :  { %1353 = vmatpush1.bf16.msra.mxu0 %v2727_v16  ;;  %v2799_v16 = vld [vmem:[%s3716_s1 + $0x30] sm:$0xff]  }
 0x16a   :  { %1354 = vmatprep.subr.bf16.mxu0 %v2735_v19  ;;  %v2802_v19 = vld [vmem:[%s3716_s1 + $0xe8] sm:$0xff]  }
 0x16d   :  { %1355 = vmatpush1.bf16.msra.mxu0 %v2733_v20  ;;  %v2803_v20 = vld [vmem:[%s3716_s1 + $0x28] sm:$0xff]  }
 0x16e   :  { %2501 = vmatprep.subr.bf16.mxu0 %v2794_v22  ;;  %v2805_v22 = vld [vmem:[%s3716_s1 + $0x60] sm:$0xff]  }
 0x1e0   :  { %v815_v23 = vpop.f32.mrf.mxu0  ;;  %v856_v24 = vpop.f32.mrf.mxu1 }
 0x1e2   :  { %v817_v25 = vpop.f32.mrf.mxu0  ;;  %v858_v26 = vpop.f32.mrf.mxu1 }
 0x1e4   :  { %v819_v27 = vpop.f32.mrf.mxu0  ;;  %v860_v28 = vpop.f32.mrf.mxu1 }
 0x1e5   :  { %v2810_v27 = vld [vmem:[%s3716_s1 + $0xd8] sm:$0xff]  }
 0x1e6   :  { %v820_v29 = vpop.f32.mrf.mxu0  ;;  %v861_v31 = vpop.f32.mrf.mxu1  ;;  %v2811_v28 = vld [vmem:[%s3716_s1 + $0x18] sm:$0xff]  }
 0x1e7   :  { %v2812_v29 = vld [vmem:[%s3716_s1 + $0x98] sm:$0xff]   ;;  %v2813_v31 = vld [vmem:[%s3716_s1 + $0x50] sm:$0xff]  }
 0x1f0   :  { %v980_v32 = vpop.f32.mrf.mxu0  ;;  %v1021_v42 = vpop.f32.mrf.mxu1 }
 0x1f1   :  { %v3407_v43 = vadd.f32 %v980_v32, %v815_v23  ;;  %v3409_v44 = vadd.f32 %v1021_v42, %v856_v24  ;;  %v2806_v23 = vld [vmem:[%s3716_s1 + $0xe0] sm:$0xff]   ;;  %v2814_v32 = vld [vmem:[%s3716_s1 + $0xd0] sm:$0xff]  }
 0x1f2   :  { %v982_v46 = vpop.f32.mrf.mxu0  ;;  %v1023_v47 = vpop.f32.mrf.mxu1  ;;  %v2807_v24 = vld [vmem:[%s3716_s1 + $0x20] sm:$0xff]   ;;  %v2815_v42 = vld [vmem:[%s3716_s1 + $0x10] sm:$0xff]  }
 0x1f3   :  { %v3411_v48 = vadd.f32 %v982_v46, %v817_v25  ;;  %v3413_v49 = vadd.f32 %v1023_v47, %v858_v26  ;;  %v2808_v25 = vld [vmem:[%s3716_s1 + $0xa0] sm:$0xff]   ;;  %v2809_v26 = vld [vmem:[%s3716_s1 + $0x58] sm:$0xff]   ;;  %v2816_v46 = vld [vmem:[%s3716_s1 + $0x90] sm:$0xff]  }
 0x1f4   :  { %v984_v51 = vpop.f32.mrf.mxu0  ;;  %v1025_v53 = vpop.f32.mrf.mxu1  ;;  %v2817_v47 = vld [vmem:[%s3716_s1 + $0x48] sm:$0xff]  }
 0x1f5   :  { %v2818_v51 = vld [vmem:[%s3716_s1 + $0xc8] sm:$0xff]   ;;  %v1410_v53 = vrot.slane %v3422_v37, %v3097_v40 }
 0x1f6   :  { %v985_v56 = vpop.f32.mrf.mxu0  ;;  %v1026_v57 = vpop.f32.mrf.mxu1  ;;  %v2754_v37 = vld [vmem:[%s3718_s3 + $0x1ac] ss:$16 sps:$4 sm:$0xff]  }
 0x1f7   :  { %v2819_v56 = vld [vmem:[%s3716_s1 + $0x8] sm:$0xff]  }
 0x1f8   :  { %v2820_v57 = vld [vmem:[%s3716_s1 + $0x88] sm:$0xff]  }
 0x210   :  { %v2446_v60 = vpop.f32.mrf.mxu0  ;;  %v2468_v61 = vpop.f32.mrf.mxu1 }
 0x212   :  { %v2447_v58 = vpop.f32.mrf.mxu0  ;;  %v2469_v62 = vpop.f32.mrf.mxu1 }
 0x213   :  { %v2448_v41 = vadd.f32 %v2447_v58, %v2446_v60  ;;  %v2470_v0 = vadd.f32 %v2469_v62, %v2468_v61  ;;  %v2821_v60 = vld [vmem:[%s3716_s1 + $0x40] sm:$0xff]   ;;  %v1425_v58 = vcombine.high %v1410_v53, %v1410_v53 }
 0x214   :  { %v2449_v63 = vpop.f32.mrf.mxu0  ;;  %v2471_v30 = vpop.f32.mrf.mxu1  ;;  %v2822_v61 = vld [vmem:[%s3716_s1 + $0xc0] sm:$0xff]  }
 0x215   :  { %v1112_v39 = vadd.f32 %v2448_v41, %v3243_v59  ;;  %v2823_v62 = vld [vmem:[%s3716_s1] sm:$0xff]   ;;  %v1388_v30 = vcombine.high %v3418_v34, %v3418_v34  ;;  %v2746_v41 = vld [vmem:[%s3718_s3 + $0x1c8] ss:$16 sps:$4 sm:$0xff]  }
 0x216   :  { %v2450_v33 = vpop.f32.mrf.mxu0  ;;  %v2472_v38 = vpop.f32.mrf.mxu1  ;;  %v2824_v63 = vld [vmem:[%s3716_s1 + $0x80] sm:$0xff]  }
 0x217   :  { %v1152_v2 = vadd.f32 %v2470_v0, %v1112_v39  ;;  %v1402_v33 = vrot.slane %v1388_v30, %v3097_v40  ;;  %v2742_v38 = vld [vmem:[%s3718_s3 + $0x1ec] ss:$16 sps:$4 sm:$0xff]   ;;  %v2751_v34 = vld [vmem:[%s3718_s3 + $0x1a4] ss:$16 sps:$4 sm:$0xff]   ;;  %v2749_v39 = vld [vmem:[%s3718_s3 + $0x1a0] ss:$16 sps:$4 sm:$0xff]  }
 0x218   :  { %v2752_v0 = vld [vmem:[%s3718_s3 + $0x1a8] ss:$16 sps:$4 sm:$0xff]   ;;  %v2774_v30 = vld [vmem:[%s3720_s5 + $0xe0] sm:$0xff]  }
 0x220   :  { %v1191_v3 = vpop.f32.mrf.mxu0 }
 0x221   :  { %v1192_v4 = vadd.f32 %v1191_v3, %v1152_v2  ;;  %v2760_v2 = vld [vmem:[%s3718_s3 + $0x18c] ss:$16 sps:$4 sm:$0xff]   ;;  %v2755_v3 = vld [vmem:[%s3718_s3 + $0x180] ss:$16 sps:$4 sm:$0xff]  }
 0x222   :  { %v2606_v5 = vpop.f32.mrf.mxu0 }
 0x223   :  { %v1197_v7 = vmax.f32 %v1192_v4, 0.0  ;;  %v2758_v4 = vld [vmem:[%s3718_s3 + $0x188] ss:$16 sps:$4 sm:$0xff]  }
 0x224   :  { %v1194_v8 = vpop.f32.mrf.mxu0  ;;  %v2761_v5 = vld [vmem:[%s3720_s5 + $0x78] sm:$0xff]  }
 0x225   :  { %v1198_v9 = vpack.c.bf16 %v1197_v7, %v1197_v7 }
 0x226   :  { %v2607_v10 = vpop.f32.mrf.mxu0 }
 0x227   :  { %2261 = vmatmul.mubr.msk.bf16.vlgmr.msra.gmra.mxu1 %vm368_vm1, %v1198_v9  ;;  %2262 = vmatmul.mubr.msk.bf16.vlgmr.msra.gmra.mxu0 %vm368_vm1, %v1198_v9 }
 0x228   :  { %2480 = vmatpush3.bf16.msra.mxu1 %v2795_v12  ;;  %2502 = vmatpush3.bf16.msra.mxu0 %v2796_v13 }
 0x229   :  { %2481 = vmatprep.subr.bf16.mxu1 %v2797_v14  ;;  %2503 = vmatprep.subr.bf16.mxu0 %v2798_v15 }
 0x22a   :  { %1466 = vmatprep.mubr.bf16.mxu1 %v1424_v6  ;;  %1506 = vmatprep.mubr.bf16.mxu0 %v1426_v11  ;;  %v2762_v6 = vld [vmem:[%s3720_s5 + $0xf8] sm:$0xff]  }
 0x22c   :  { %2482 = vmatpush3.bf16.msra.mxu1 %v2799_v16  ;;  %2504 = vmatpush3.bf16.msra.mxu0 %v2800_v17 }
 0x22d   :  { %2483 = vmatprep.subr.bf16.mxu1 %v2801_v18  ;;  %2505 = vmatprep.subr.bf16.mxu0 %v2802_v19 }
 0x230   :  { %2484 = vmatpush3.bf16.msra.mxu1 %v2803_v20  ;;  %2506 = vmatpush3.bf16.msra.mxu0 %v2804_v21 }
 0x231   :  { %2485 = vmatprep.subr.bf16.mxu1 %v2805_v22  ;;  %2507 = vmatprep.subr.bf16.mxu0 %v2806_v23 }
 0x234   :  { %2486 = vmatpush3.bf16.msra.mxu1 %v2807_v24  ;;  %2508 = vmatpush3.bf16.msra.mxu0 %v2808_v25 }
 0x235   :  { %2487 = vmatprep.subr.bf16.mxu1 %v2809_v26  ;;  %2509 = vmatprep.subr.bf16.mxu0 %v2810_v27 }
 0x238   :  { %2488 = vmatpush3.bf16.msra.mxu1 %v2811_v28  ;;  %2510 = vmatpush3.bf16.msra.mxu0 %v2812_v29 }
 0x239   :  { %2489 = vmatprep.subr.bf16.mxu1 %v2813_v31  ;;  %2511 = vmatprep.subr.bf16.mxu0 %v2814_v32 }
 0x23c   :  { %2490 = vmatpush3.bf16.msra.mxu1 %v2815_v42  ;;  %2512 = vmatpush3.bf16.msra.mxu0 %v2816_v46  ;;  %v2763_v42 = vld [vmem:[%s3720_s5 + $0x38] sm:$0xff]  }
 0x23d   :  { %2491 = vmatprep.subr.bf16.mxu1 %v2817_v47  ;;  %2513 = vmatprep.subr.bf16.mxu0 %v2818_v51  ;;  %v2764_v46 = vld [vmem:[%s3720_s5 + $0xb8] sm:$0xff]   ;;  %v2766_v51 = vld [vmem:[%s3720_s5 + $0xf0] sm:$0xff]  }
 0x240   :  { %2492 = vmatpush3.bf16.msra.mxu1 %v2819_v56  ;;  %2514 = vmatpush3.bf16.msra.mxu0 %v2820_v57  ;;  %v2767_v56 = vld [vmem:[%s3720_s5 + $0x30] sm:$0xff]  }
 0x241   :  { %2493 = vmatprep.subr.bf16.mxu1 %v2821_v60  ;;  %2515 = vmatprep.subr.bf16.mxu0 %v2822_v61  ;;  %v2768_v57 = vld [vmem:[%s3720_s5 + $0xb0] sm:$0xff]   ;;  %v2769_v60 = vld [vmem:[%s3720_s5 + $0x68] sm:$0xff]  }
 0x242   :  { %v2770_v61 = vld [vmem:[%s3720_s5 + $0xe8] sm:$0xff]  }
 0x244   :  { %2494 = vmatpush3.bf16.msra.mxu1 %v2823_v62  ;;  %2516 = vmatpush3.bf16.msra.mxu0 %v2824_v63  ;;  %v2772_v62 = vld [vmem:[%s3720_s5 + $0xa8] sm:$0xff]   ;;  %v2773_v63 = vld [vmem:[%s3720_s5 + $0x60] sm:$0xff]  }
 0x245   :  { %2608 = vmatprep.subr.bf16.mxu1 %v2848_v36 }
 0x247   :  { %1467 = vmatmul.mubr.bf16.vlgmr.msra.gmra.mxu1 %v1410_v53  ;;  %1507 = vmatmul.mubr.bf16.vlgmr.msra.gmra.mxu0 %v1425_v58  ;;  %v2771_v58 = vld [vmem:[%s3720_s5 + $0x28] sm:$0xff]  }
 0x248   :  { %2609 = vmatpush3.bf16.msra.mxu1 %v3106_v45  ;;  %2616 = vmatprep.mubr.msk.bf16.mxu1 %vm2849_vm0, %v2848_v36  ;;  %v1417_v45 = vrot.slane %v1402_v33, %v3097_v40  ;;  %v2740_v40 = vld [vmem:[%s3718_s3 + $0x1e8] ss:$16 sps:$4 sm:$0xff]   ;;  %v2775_v33 = vld [vmem:[%s3720_s5 + $0x20] sm:$0xff]  }
 0x249   :  { %2610 = vmatprep.subr.bf16.mxu1 %v2848_v36  ;;  %1688 = vmatprep.mubr.bf16.mxu0 %v2850_v55 }
 0x24c   :  { %2611 = vmatpush3.bf16.msra.mxu1 %v3112_v50  ;;  %v2739_v50 = vld [vmem:[%s3718_s3 + $0x1e4] ss:$16 sps:$4 sm:$0xff]  }
 0x24d   :  { %2612 = vmatprep.subr.bf16.mxu1 %v2848_v36  ;;  %1664 = vmatprep.subr.bf16.mxu0 %v2739_v50  ;;  %v2777_v50 = vld [vmem:[%s3720_s5 + $0x58] sm:$0xff]  }
 0x250   :  { %2613 = vmatpush3.bf16.msra.mxu1 %v3121_v52  ;;  %v2745_v52 = vld [vmem:[%s3718_s3 + $0x1c4] ss:$16 sps:$4 sm:$0xff]  }
 0x251   :  { %2614 = vmatprep.subr.bf16.mxu1 %v2848_v36  ;;  %v2737_v36 = vld [vmem:[%s3718_s3 + $0x1e0] ss:$16 sps:$4 sm:$0xff]  }
 0x252   :  { %1665 = vmatpush1.bf16.msra.mxu0 %v2737_v36  ;;  %v2779_v36 = vld [vmem:[%s3720_s5 + $0x18] sm:$0xff]  }
 0x253   :  { %1666 = vmatprep.subr.bf16.mxu0 %v2745_v52  ;;  %v2781_v52 = vld [vmem:[%s3720_s5 + $0x50] sm:$0xff]  }
 0x254   :  { %2615 = vmatpush3.bf16.msra.mxu1 %v3132_v54  ;;  %v2748_v54 = vld [vmem:[%s3718_s3 + $0x1cc] ss:$16 sps:$4 sm:$0xff]  }
 0x255   :  { %1705 = vmatprep.subr.bf16.mxu1 %v2742_v38  ;;  %v2778_v38 = vld [vmem:[%s3720_s5 + $0xd8] sm:$0xff]  }
 0x257   :  { %2617 = vmatmul.mubr.msk.bf16.vlgmr.msra.gmra.mxu1 %vm368_vm1, %v1417_v45  ;;  %v2776_v45 = vld [vmem:[%s3720_s5 + $0xa0] sm:$0xff]  }
 0x258   :  { %1729 = vmatprep.mubr.bf16.mxu1 %v2850_v55  ;;  %1706 = vmatpush1.bf16.msra.mxu1 %v2740_v40  ;;  %v2743_v55 = vld [vmem:[%s3718_s3 + $0x1c0] ss:$16 sps:$4 sm:$0xff]   ;;  %v2780_v40 = vld [vmem:[%s3720_s5 + $0x98] sm:$0xff]  }
 0x259   :  { %1707 = vmatprep.subr.bf16.mxu1 %v2748_v54  ;;  %1667 = vmatpush1.bf16.msra.mxu0 %v2743_v55  ;;  %v2782_v54 = vld [vmem:[%s3720_s5 + $0xd0] sm:$0xff]  }
 0x25a   :  { %1668 = vmatprep.subr.bf16.mxu0 %v2751_v34  ;;  %v2783_v55 = vld [vmem:[%s3720_s5 + $0x10] sm:$0xff]   ;;  %v2785_v34 = vld [vmem:[%s3720_s5 + $0x48] sm:$0xff]  }
 0x25c   :  { %1708 = vmatpush1.bf16.msra.mxu1 %v2746_v41  ;;  %v2784_v41 = vld [vmem:[%s3720_s5 + $0x90] sm:$0xff]  }
 0x25d   :  { %1709 = vmatprep.subr.bf16.mxu1 %v2754_v37  ;;  %1669 = vmatpush1.bf16.msra.mxu0 %v2749_v39  ;;  %v2786_v37 = vld [vmem:[%s3720_s5 + $0xc8] sm:$0xff]  }
 0x25e   :  { %1670 = vmatprep.subr.bf16.mxu0 %v2757_v1  ;;  %v2787_v39 = vld [vmem:[%s3720_s5 + $0x8] sm:$0xff]   ;;  %v2789_v1 = vld [vmem:[%s3720_s5 + $0x40] sm:$0xff]  }
 0x260   :  { %1710 = vmatpush1.bf16.msra.mxu1 %v2752_v0  ;;  %v2788_v0 = vld [vmem:[%s3720_s5 + $0x88] sm:$0xff]  }
 0x261   :  { %1711 = vmatprep.subr.bf16.mxu1 %v2760_v2  ;;  %1671 = vmatpush1.bf16.msra.mxu0 %v2755_v3  ;;  %v2790_v2 = vld [vmem:[%s3720_s5 + $0xc0] sm:$0xff]  }
 0x262   :  { %2528 = vmatprep.subr.bf16.mxu0 %v2761_v5  ;;  %v2791_v3 = vld [vmem:[%s3720_s5] sm:$0xff]   ;;  %v1746_v5 = vsub.s32 0, %v3084_v35 }
 0x264   :  { %1712 = vmatpush1.bf16.msra.mxu1 %v2758_v4  ;;  %v2792_v4 = vld [vmem:[%s3720_s5 + $0x80] sm:$0xff]  }
 0x265   :  { %2550 = vmatprep.subr.bf16.mxu1 %v2762_v6  ;;  %v1754_v6 = vsub.s32 2, %v3084_v35 }
 0x2e7   :  { %v1333_v7 = vpop.f32.mrf.mxu1  ;;  %v1374_v8 = vpop.f32.mrf.mxu0 }
 0x2e8   :  { %v3594_v9 = vadd.f32 %v1333_v7, %v3407_v43  ;;  %v3597_v10 = vadd.f32 %v1374_v8, %v3409_v44  ;;  %v1742_v7 = vld [vmem:[%s3719_s4] sm:$0xf]  ;;  %v1750_v8 = vsub.s32 1, %v3084_v35 }
 0x2e9   :  { %v1335_v11 = vpop.f32.mrf.mxu1  ;;  %v1376_v12 = vpop.f32.mrf.mxu0 }
 0x2ea   :  { %v3600_v13 = vadd.f32 %v1335_v11, %v3411_v48  ;;  %v3603_v14 = vadd.f32 %v1376_v12, %v3413_v49  ;;  %v1758_v11 = vsub.s32 3, %v3084_v35  ;;  %v1747_v12 = vrot.slane %v1742_v7, %v1746_v5 }
 0x2eb   :  { %v1337_v15 = vpop.f32.mrf.mxu1  ;;  %v1378_v16 = vpop.f32.mrf.mxu0 }
 0x2ec   :  { %v1755_v15 = vrot.slane %v1742_v7, %v1754_v6 }
 0x2ed   :  { %v1338_v17 = vpop.f32.mrf.mxu1  ;;  %v1379_v18 = vpop.f32.mrf.mxu0 }
 0x307   :  { %v2495_v19 = vpop.f32.mrf.mxu1  ;;  %v2517_v20 = vpop.f32.mrf.mxu0 }
 0x309   :  { %v2496_v21 = vpop.f32.mrf.mxu1  ;;  %v2518_v43 = vpop.f32.mrf.mxu0 }
 0x30a   :  { %v2497_v25 = vadd.f32 %v2496_v21, %v2495_v19  ;;  %v2519_v48 = vadd.f32 %v2518_v43, %v2517_v20  ;;  %v1751_v20 = vrot.slane %v1742_v7, %v1750_v8  ;;  %v1759_v21 = vrot.slane %v1742_v7, %v1758_v11 }
 0x30b   :  { %v2498_v22 = vpop.f32.mrf.mxu1  ;;  %v2520_v23 = vpop.f32.mrf.mxu0 }
 0x30c   :  { %v1469_v26 = vadd.f32 %v2497_v25, %v3243_v59  ;;  %v2765_v59 = vld [vmem:[%s3720_s5 + $0x70] sm:$0xff]  }
 0x30d   :  { %v2499_v44 = vpop.f32.mrf.mxu1  ;;  %v2521_v24 = vpop.f32.mrf.mxu0 }
 0x30e   :  { %v1509_v27 = vadd.f32 %v2519_v48, %v1469_v26 }
 0x317   :  { %v1548_v28 = vpop.f32.mrf.mxu1 }
 0x318   :  { %v1549_v49 = vadd.f32 %v1548_v28, %v1509_v27 }
 0x319   :  { %v2618_v29 = vpop.f32.mrf.mxu1 }
 0x31a   :  { %v1554_v31 = vmax.f32 %v1549_v49, 0.0 }
 0x31b   :  { %v1551_v32 = vpop.f32.mrf.mxu1 }
 0x31c   :  { %v1555_v47 = vpack.c.bf16 %v1554_v31, %v1554_v31 }
 0x31d   :  { %v2619_v53 = vpop.f32.mrf.mxu1 }
 0x31e   :  { %2297 = vmatmul.mubr.msk.bf16.vlgmr.msra.gmra.mxu0 %vm368_vm1, %v1555_v47  ;;  %2298 = vmatmul.mubr.msk.bf16.vlgmr.msra.gmra.mxu1 %vm368_vm1, %v1555_v47 }
 0x31f   :  { %2529 = vmatpush3.bf16.msra.mxu0 %v2763_v42  ;;  %2551 = vmatpush3.bf16.msra.mxu1 %v2764_v46 }
 0x320   :  { %2530 = vmatprep.subr.bf16.mxu0 %v2765_v59  ;;  %2552 = vmatprep.subr.bf16.mxu1 %v2766_v51  ;;  %v2299_v59 = vld [vmem:[%s3721_s6] ss:$0 sm:$0xff] }
 0x323   :  { %2531 = vmatpush3.bf16.msra.mxu0 %v2767_v56  ;;  %2553 = vmatpush3.bf16.msra.mxu1 %v2768_v57 }
 0x324   :  { %2532 = vmatprep.subr.bf16.mxu0 %v2769_v60  ;;  %2554 = vmatprep.subr.bf16.mxu1 %v2770_v61 }
 0x327   :  { %2533 = vmatpush3.bf16.msra.mxu0 %v2771_v58  ;;  %2555 = vmatpush3.bf16.msra.mxu1 %v2772_v62 }
 0x328   :  { %2534 = vmatprep.subr.bf16.mxu0 %v2773_v63  ;;  %2556 = vmatprep.subr.bf16.mxu1 %v2774_v30 }
 0x32b   :  { %2535 = vmatpush3.bf16.msra.mxu0 %v2775_v33  ;;  %2557 = vmatpush3.bf16.msra.mxu1 %v2776_v45 }
 0x32c   :  { %2536 = vmatprep.subr.bf16.mxu0 %v2777_v50  ;;  %2558 = vmatprep.subr.bf16.mxu1 %v2778_v38 }
 0x32f   :  { %2537 = vmatpush3.bf16.msra.mxu0 %v2779_v36  ;;  %2559 = vmatpush3.bf16.msra.mxu1 %v2780_v40 }
 0x330   :  { %2538 = vmatprep.subr.bf16.mxu0 %v2781_v52  ;;  %2560 = vmatprep.subr.bf16.mxu1 %v2782_v54 }
 0x333   :  { %2539 = vmatpush3.bf16.msra.mxu0 %v2783_v55  ;;  %2561 = vmatpush3.bf16.msra.mxu1 %v2784_v41 }
 0x334   :  { %2540 = vmatprep.subr.bf16.mxu0 %v2785_v34  ;;  %2562 = vmatprep.subr.bf16.mxu1 %v2786_v37 }
 0x337   :  { %2541 = vmatpush3.bf16.msra.mxu0 %v2787_v39  ;;  %2563 = vmatpush3.bf16.msra.mxu1 %v2788_v0 }
 0x338   :  { %2542 = vmatprep.subr.bf16.mxu0 %v2789_v1  ;;  %2564 = vmatprep.subr.bf16.mxu1 %v2790_v2 }
 0x33b   :  { %2543 = vmatpush3.bf16.msra.mxu0 %v2791_v3  ;;  %2565 = vmatpush3.bf16.msra.mxu1 %v2792_v4 }
 0x3de   :  { %v1690_v16 = vpop.f32.mrf.mxu0  ;;  %v1731_v17 = vpop.f32.mrf.mxu1 }
 0x3df   :  { %v1738_v18 = vadd.f32 %v1690_v16, %v3594_v9  ;;  %v1740_v19 = vadd.f32 %v1731_v17, %v3597_v10 }
 0x3e0   :  { %v1692_v43 = vpop.f32.mrf.mxu0  ;;  %v1733_v22 = vpop.f32.mrf.mxu1 }
 0x3e1   :  { %v1764_v23 = vadd.f32 %v1747_v12, %v1738_v18  ;;  %v1766_v44 = vadd.f32 %v1755_v15, %v1740_v19  ;;  %v1739_v24 = vadd.f32 %v1692_v43, %v3600_v13  ;;  %v1741_v25 = vadd.f32 %v1733_v22, %v3603_v14 }
 0x3e2   :  { %v1694_v26 = vpop.f32.mrf.mxu0  ;;  %v1735_v35 = vpop.f32.mrf.mxu1 }
 0x3e3   :  { %v1765_v48 = vadd.f32 %v1751_v20, %v1739_v24  ;;  %v1767_v27 = vadd.f32 %v1759_v21, %v1741_v25  ;;  %v1768_v28 = vmax.f32 %v1764_v23, 0.0  ;;  %v1770_v49 = vmax.f32 %v1766_v44, 0.0 }
 0x3e4   :  { %v1695_v29 = vpop.f32.mrf.mxu0  ;;  %v1736_v9 = vpop.f32.mrf.mxu1 }
 0x3e5   :  { %v1769_v31 = vmax.f32 %v1765_v48, 0.0  ;;  %v1771_v10 = vmax.f32 %v1767_v27, 0.0  ;;  %v1772_v46 = vpack.c.bf16 %v1768_v28, %v1768_v28  ;;  %v1774_v47 = vpack.c.bf16 %v1770_v49, %v1770_v49 }
 0x3e7   :  { %v1773_v32 = vpack.c.bf16 %v1769_v31, %v1769_v31  ;;  %v1775_v42 = vpack.c.bf16 %v1771_v10, %v1771_v10 }
 0x3e9   :  { %2071 = vmatprep.mubr.bf16.mxu0 %v1773_v32  ;;  %2111 = vmatprep.mubr.bf16.mxu1 %v1775_v42 }
 0x3ea   :  { %2072 = vmatmul.mubr.bf16.vlgmr.msra.gmra.mxu0 %v1772_v46  ;;  %2112 = vmatmul.mubr.bf16.vlgmr.msra.gmra.mxu1 %v1774_v47 }
 0x4aa   :  { %v2544_v13 = vpop.f32.mrf.mxu0  ;;  %v2566_v14 = vpop.f32.mrf.mxu1 }
 0x4ac   :  { %v2545_v51 = vpop.f32.mrf.mxu0  ;;  %v2567_v53 = vpop.f32.mrf.mxu1 }
 0x4ad   :  { %v2546_v56 = vadd.f32 %v2545_v51, %v2544_v13  ;;  %v2568_v58 = vadd.f32 %v2567_v53, %v2566_v14 }
 0x4ae   :  { %v2547_v57 = vpop.f32.mrf.mxu0  ;;  %v2569_v60 = vpop.f32.mrf.mxu1 }
 0x4af   :  { %v2074_v61 = vadd.f32 %v2546_v56, %v2299_v59 }
 0x4b0   :  { %v2548_v62 = vpop.f32.mrf.mxu0  ;;  %v2570_v63 = vpop.f32.mrf.mxu1 }
 0x4b1   :  { %v2114_v30 = vadd.f32 %v2568_v58, %v2074_v61 }
 0x4b3   :  { %2120 = vst.msk [vmem:[#allocation2] sm:$0x3] %vm2119_vm2, %v2114_v30 }
 0x4b4   :  { %2836 = shalt.err (!%p2833_p4)
}
 0x4b5   :  { %2130 = dma.vmem_to_hbm [thread:$0]  %s2128_s20, 32, %s3722_s7, [#allocation3]  }
 0x4b6   :  { %2845 = dma.done.wait [#allocation3], 32  }
 0x4b7   :  { %2846 = vsyncadd [#allocation3], 4294967264 }
 0x4b8   :  { %2134 = vsyncpa [#allocation3], 1 }

</bundles_post_ra>
